<compile_context>
chip_gen: v6e
topology: v6e:2x2x1
jax: 0.10.0
libtpu: 0.0.40
codegen_flags: <defaults>
</compile_context>

<pallas_src>
import functools

import jax
import jax.numpy as jnp
from jax.experimental import pallas as pl
from jax.experimental.pallas import tpu as pltpu


def _round_up(x, m):
    return ((x + m - 1) // m) * m


def _cdiv(a, b):
    return -(-a // b)


# ---------------------------------------------------------------------------
# Pallas kernel: channels on sublanes, spatial positions on lanes.
# ---------------------------------------------------------------------------
def clla_kernel(x2_ref, loc_ref, wq_ref, bq_ref, wkv_ref, bkv_ref, out_ref,
                *, C, R2):
    f32 = jnp.float32
    P = R2 * C

    x2 = x2_ref[...].astype(f32)            # (C, TS)   positions on lanes
    loc = loc_ref[...]                      # (P, TS)   neighbour-major sublanes, bf16

    # q, replicated across the R2 neighbour blocks and pre-scaled by 1/range
    # (both folded into the packed weight): q_pk[r*C + co, t] = q[co, t] / R.
    q_pk = jnp.dot(wq_ref[...], x2, preferred_element_type=f32) + bq_ref[...]    # (P, TS)

    # k and v for every neighbour in one stacked block-diagonal matmul:
    # (2P, P) @ (P, TS) -> (2P, TS); f32 accumulation.
    kv = jnp.dot(wkv_ref[...], loc, preferred_element_type=f32) + bkv_ref[...]   # (2P, TS)
    k_pk = kv[:P]                           # (P, TS)
    v_pk = kv[P:]                           # (P, TS)

    # In-kernel constant selector (no HBM stream / DMA / double-buffer):
    # member[r, p] == 1 iff sublane p belongs to neighbour block r.
    p_idx = jax.lax.broadcasted_iota(jnp.int32, (R2, P), 1)
    blk_lo = jax.lax.broadcasted_iota(jnp.int32, (R2, P), 0) * C
    member = jnp.where(jnp.logical_and(p_idx >= blk_lo, p_idx < blk_lo + C),
                       1.0, 0.0).astype(f32)                                     # (R2, P)
    # irr[r] = (2/R2) * sum_r' dots[r'] - dots[r], with dots already carrying
    # the 1/range scale (folded into q) -- all folded into one selector matmul.
    s_irr = (2.0 / R2) - member                                                  # (R2, P)
    irr = jnp.dot(s_irr, q_pk * k_pk, preferred_element_type=f32)                # (R2, TS)

    # Manual softmax over the R2 neighbour rows; divide goes to the EUP.
    m = jnp.max(irr, axis=0, keepdims=True)                                      # (1, TS)
    e = jnp.exp(irr - m)                                                         # (R2, TS)
    denom = jnp.sum(e, axis=0, keepdims=True)                                    # (1, TS)
    att = e * pl.reciprocal(denom, approx=True)                                  # (R2, TS)

    # Broadcast att over each neighbour's C sublanes with a tiny K=R2 matmul
    # (nearly free in this orientation), weight v, and fold the R2 blocks with
    # plain aligned sublane-slice adds (no output-reduce matmul needed).
    p2 = jax.lax.broadcasted_iota(jnp.int32, (P, R2), 0)
    lo2 = jax.lax.broadcasted_iota(jnp.int32, (P, R2), 1) * C
    e_exp = jnp.where(jnp.logical_and(p2 >= lo2, p2 < lo2 + C),
                      1.0, 0.0).astype(f32)                                      # (P, R2)
    att_pk = jnp.dot(e_exp, att, preferred_element_type=f32)                     # (P, TS)

    prod = v_pk * att_pk                                                         # (P, TS)
    out = prod[0:C]
    for r in range(1, R2):
        out = out + prod[r * C:(r + 1) * C]                                      # (C, TS)

    out_ref[...] = ((out + x2) * 0.5).astype(out_ref.dtype)


# ---------------------------------------------------------------------------
# Neighbourhood gather into the transposed layout (b, R2*C, w2*h2).
# ---------------------------------------------------------------------------
def _gather_local_t(x1, w2, h2, R, out_dtype):
    """Sublane index = r*C + c with r = i*R + j (torch loop order);
    lane index = wi*h2 + hi (matches x2.reshape(b, C, w2*h2))."""
    b, C, w1, h1 = x1.shape
    R2 = R * R
    if R == 2 and w1 == 2 * w2 and h1 == 2 * h2:
        # pad = 0 for R = 2; the gather is an exact space-to-depth permutation,
        # fused with the bf16 downcast (single read of x1, half-width write).
        t = x1.reshape(b, C, w2, 2, h2, 2)
        t = jnp.transpose(t, (0, 3, 5, 1, 2, 4))          # (b, i, j, C, w2, h2)
        return t.reshape(b, R2 * C, w2 * h2).astype(out_dtype)
    # Generic path: mirrors the torch loop (zero pad, stride-2 sample, crop).
    pad = int(R / 2 - 1)
    x1p = jnp.pad(x1, ((0, 0), (0, 0), (pad, pad), (pad, pad)))
    locs = []
    for i in range(R):
        for j in range(R):
            tem = x1p[:, :, i::2, j::2]
            assert tem.shape[2] >= w2 and tem.shape[3] >= h2, (
                "CLLA local gather: x1 spatial size incompatible with x2 "
                "(expects x1 at ~2x the spatial resolution of x2).")
            locs.append(tem[:, :, :w2, :h2])
    local = jnp.stack(locs, axis=1)                        # (b, R2, C, w2, h2)
    return local.reshape(b, R2 * C, w2 * h2).astype(out_dtype)


# ---------------------------------------------------------------------------
# Wrapper: NCHW-native glue, weight packing, pallas_call.
# ---------------------------------------------------------------------------
def clla_forward(x1, x2, params, attn_range, tile_cols=None, acts_bf16=True):
    b1, c1, w1, h1 = x1.shape
    b, C, w2, h2 = x2.shape
    assert b1 == b and c1 == C
    R = int(attn_range)
    R2 = R * R
    P = R2 * C
    S2 = w2 * h2

    # --- activations: x2/out stay in native NCHW (free reshape, lane-dense) ---
    loc_dtype = jnp.bfloat16 if acts_bf16 else x1.dtype
    loc = _gather_local_t(x1, w2, h2, R, loc_dtype)        # (b, P, S2)
    x2r = x2.reshape(b, C, S2)                             # (b, C, S2), no copy

    # --- weights, packed once (tiny, wrapper side), W^T @ X orientation ---
    wq, bq, wk, bk, wv, bv = params                        # (C_in, C_out) layout
    f32 = jnp.float32
    inv_r = 1.0 / float(R)                                 # fold 1/range into q
    wq_pk = jnp.tile(wq.astype(f32).T * inv_r, (R2, 1))                     # (P, C)
    bq_pk = jnp.tile(bq.astype(f32).reshape(C, 1) * inv_r, (R2, 1))         # (P, 1)
    eye_r2 = jnp.eye(R2, dtype=f32)
    wkv_pk = jnp.concatenate([jnp.kron(eye_r2, wk.astype(f32).T),
                              jnp.kron(eye_r2, wv.astype(f32).T)], axis=0)  # (2P, P)
    wkv_pk = wkv_pk.astype(loc_dtype)    # MXU runs bf16 passes anyway
    bkv_pk = jnp.concatenate([jnp.tile(bk.astype(f32).reshape(C, 1), (R2, 1)),
                              jnp.tile(bv.astype(f32).reshape(C, 1), (R2, 1))],
                             axis=0)                                         # (2P, 1)

    # --- tiling: big lane-dense spatial tiles, even total step count ---
    target = 2048 if tile_cols is None else max(128, int(tile_cols))
    n_s = max(1, _cdiv(S2, target))
    if (b * n_s) % 2 == 1 and S2 > 128:
        n_s += 1                         # v7x megacore: keep total steps even
    ts = _round_up(_cdiv(S2, n_s), 128)
    n_s = _cdiv(S2, ts)
    s2p = ts * n_s
    if s2p != S2:                        # ragged tail: zero-pad spatial columns
        x2r = jnp.pad(x2r, ((0, 0), (0, 0), (0, s2p - S2)))
        loc = jnp.pad(loc, ((0, 0), (0, 0), (0, s2p - S2)))

    out_r = pl.pallas_call(
        functools.partial(clla_kernel, C=C, R2=R2),
        out_shape=jax.ShapeDtypeStruct((b, C, s2p), x2.dtype),
        grid_spec=pltpu.PrefetchScalarGridSpec(
            num_scalar_prefetch=0,
            grid=(b, n_s),
            in_specs=[
                pl.BlockSpec((None, C, ts), lambda bi, si: (bi, 0, si)),   # x2 (C, TS)
                pl.BlockSpec((None, P, ts), lambda bi, si: (bi, 0, si)),   # loc (P, TS)
                pl.BlockSpec((P, C), lambda bi, si: (0, 0)),               # Wq packed
                pl.BlockSpec((P, 1), lambda bi, si: (0, 0)),               # bq packed
                pl.BlockSpec((2 * P, P), lambda bi, si: (0, 0)),           # [Wk; Wv] block-diag
                pl.BlockSpec((2 * P, 1), lambda bi, si: (0, 0)),           # [bk; bv]
            ],
            out_specs=pl.BlockSpec((None, C, ts), lambda bi, si: (bi, 0, si)),
        ),
        compiler_params=pltpu.CompilerParams(
            dimension_semantics=("parallel", "parallel"),
            vmem_limit_bytes=32 * 1024 * 1024),
    )(x2r, loc, wq_pk, bq_pk, wkv_pk, bkv_pk)

    out = out_r if s2p == S2 else out_r[:, :, :S2]
    return out.reshape(b, C, w2, h2)


# ---------------------------------------------------------------------------
# Pure-JAX reference (mirrors the torch forward) for a correctness check.
# ---------------------------------------------------------------------------
def clla_ref(x1, x2, params, attn_range):
    b, C, w2, h2 = x2.shape
    R = int(attn_range)
    pad = int(R / 2 - 1)
    wq, bq, wk, bk, wv, bv = params
    x2_ = jnp.transpose(x2, (0, 2, 3, 1))[:, :, :, None, :]   # (b,w2,h2,1,C)
    x1p = jnp.pad(x1, ((0, 0), (0, 0), (pad, pad), (pad, pad)))
    locs = []
    for i in range(R):
        for j in range(R):
            tem = x1p[:, :, i::2, j::2][:, :, :w2, :h2]
            locs.append(tem[:, :, None, :, :])
    local = jnp.concatenate(locs, axis=2)
    x1t = jnp.transpose(local, (0, 3, 4, 2, 1))               # (b,w2,h2,R2,C)
    q = x2_ @ wq + bq
    k = x1t @ wk + bk
    v = x1t @ wv + bv
    dots = jnp.sum(q * k / R, axis=4)
    irr = jnp.mean(dots, axis=3, keepdims=True) * 2 - dots
    att = jax.nn.softmax(irr, axis=-1)
    out = jnp.sum(v * att[..., None], axis=3)                 # (b,w2,h2,C)
    out = jnp.transpose(out, (0, 3, 1, 2))
    return (out + x2) / 2


if __name__ == "__main__":
    # Small shapes consistent with the module: x1 at 2x the spatial res of x2.
    B, C = 2, 32
    W2 = H2 = 16
    W1 = H1 = 32
    RANGE = 2

    key = jax.random.PRNGKey(0)
    k1, k2, kq, kbq, kk, kbk, kv, kbv = jax.random.split(key, 8)

    x1 = jax.random.normal(k1, (B, C, W1, H1), dtype=jnp.float32)
    x2 = jax.random.normal(k2, (B, C, W2, H2), dtype=jnp.float32)

    # Deterministic synthetic Linear(c, c) params; stored as (C_in, C_out)
    # i.e. already transposed relative to torch's (out, in) weight layout.
    wq = 0.1 * jax.random.normal(kq, (C, C), dtype=jnp.float32)
    bq = 0.1 * jax.random.normal(kbq, (C,), dtype=jnp.float32)
    wk = 0.1 * jax.random.normal(kk, (C, C), dtype=jnp.float32)
    bk = 0.1 * jax.random.normal(kbk, (C,), dtype=jnp.float32)
    wv = 0.1 * jax.random.normal(kv, (C, C), dtype=jnp.float32)
    bv = 0.1 * jax.random.normal(kbv, (C,), dtype=jnp.float32)
    params = (wq, bq, wk, bk, wv, bv)

    clla = jax.jit(functools.partial(clla_forward, attn_range=RANGE))
    out = jax.block_until_ready(clla(x1, x2, params))
    ref = jax.block_until_ready(clla_ref(x1, x2, params, RANGE))

    assert out.shape == (B, C, W2, H2)
    # Tolerance covers the bf16 activation stream and the TPU default
    # (bfloat16-pass) matmul precision; typical error is far smaller.
    assert jnp.allclose(out, ref, rtol=2e-2, atol=2e-2), "mismatch vs reference"

    print("KERNEL_OK")
</pallas_src>

<mosaic_0001>
module attributes {stable_mosaic.version = 11 : i64} {
  func.func @clla_kernel(%arg0: i32, %arg1: i32, %arg2: memref<1x32x256xf32, #tpu.memory_space<vmem>>, %arg3: memref<1x128x256xbf16, #tpu.memory_space<vmem>>, %arg4: memref<128x32xf32, #tpu.memory_space<vmem>>, %arg5: memref<128x1xf32, #tpu.memory_space<vmem>>, %arg6: memref<256x128xbf16, #tpu.memory_space<vmem>>, %arg7: memref<256x1xf32, #tpu.memory_space<vmem>>, %arg8: memref<1x32x256xf32, #tpu.memory_space<vmem>>) attributes {dimension_semantics = [#tpu.dimension_semantics<parallel>, #tpu.dimension_semantics<parallel>], iteration_bounds = array<i64: 2, 1>, scalar_prefetch = 0 : i64, scratch_operands = 0 : i64, tpu.core_type = #tpu.core_type<tc>, window_params = [{transform_indices = @transform_0, window_bounds = array<i64: 1, 32, 256>}, {transform_indices = @transform_1, window_bounds = array<i64: 1, 128, 256>}, {pipeline_mode = #tpu.pipeline_mode<synchronous>, transform_indices = @transform_2, window_bounds = array<i64: 128, 32>}, {pipeline_mode = #tpu.pipeline_mode<synchronous>, transform_indices = @transform_3, window_bounds = array<i64: 128, 1>}, {pipeline_mode = #tpu.pipeline_mode<synchronous>, transform_indices = @transform_4, window_bounds = array<i64: 256, 128>}, {pipeline_mode = #tpu.pipeline_mode<synchronous>, transform_indices = @transform_5, window_bounds = array<i64: 256, 1>}, {transform_indices = @transform_6, window_bounds = array<i64: 1, 32, 256>}]} {
    %c0 = arith.constant 0 : index
    %c0_0 = arith.constant 0 : index
    %c0_1 = arith.constant 0 : index
    %0 = vector.load %arg2[%c0, %c0_0, %c0_1] : memref<1x32x256xf32, #tpu.memory_space<vmem>>, vector<1x32x256xf32>
    %1 = vector.shape_cast %0 : vector<1x32x256xf32> to vector<32x256xf32>
    %c0_2 = arith.constant 0 : index
    %c0_3 = arith.constant 0 : index
    %c0_4 = arith.constant 0 : index
    %2 = vector.load %arg3[%c0_2, %c0_3, %c0_4] : memref<1x128x256xbf16, #tpu.memory_space<vmem>>, vector<1x128x256xbf16>
    %3 = vector.shape_cast %2 : vector<1x128x256xbf16> to vector<128x256xbf16>
    %c0_5 = arith.constant 0 : index
    %c0_6 = arith.constant 0 : index
    %4 = vector.load %arg4[%c0_5, %c0_6] : memref<128x32xf32, #tpu.memory_space<vmem>>, vector<128x32xf32>
    %cst = arith.constant dense<0.000000e+00> : vector<128x256xf32>
    %5 = tpu.matmul %4, %1, %cst {dimension_numbers = #tpu.dot_dimension_numbers<[1], [0], [0], [1], [0, 0, 1, 1], [], []>} : vector<128x32xf32>, vector<32x256xf32>, vector<128x256xf32> -> vector<128x256xf32>
    %c0_7 = arith.constant 0 : index
    %c0_8 = arith.constant 0 : index
    %6 = vector.load %arg5[%c0_7, %c0_8] : memref<128x1xf32, #tpu.memory_space<vmem>>, vector<128x1xf32>
    %7 = vector.broadcast %6 : vector<128x1xf32> to vector<128x256xf32>
    %8 = arith.addf %5, %7 : vector<128x256xf32>
    %c0_9 = arith.constant 0 : index
    %c0_10 = arith.constant 0 : index
    %9 = vector.load %arg6[%c0_9, %c0_10] : memref<256x128xbf16, #tpu.memory_space<vmem>>, vector<256x128xbf16>
    %cst_11 = arith.constant dense<0.000000e+00> : vector<256x256xf32>
    %10 = tpu.matmul %9, %3, %cst_11 {dimension_numbers = #tpu.dot_dimension_numbers<[1], [0], [0], [1], [0, 0, 1, 1], [], []>} : vector<256x128xbf16>, vector<128x256xbf16>, vector<256x256xf32> -> vector<256x256xf32>
    %c0_12 = arith.constant 0 : index
    %c0_13 = arith.constant 0 : index
    %11 = vector.load %arg7[%c0_12, %c0_13] : memref<256x1xf32, #tpu.memory_space<vmem>>, vector<256x1xf32>
    %12 = vector.broadcast %11 : vector<256x1xf32> to vector<256x256xf32>
    %13 = arith.addf %10, %12 : vector<256x256xf32>
    %14 = vector.extract_strided_slice %13 {offsets = [0, 0], sizes = [128, 256], strides = [1, 1]} : vector<256x256xf32> to vector<128x256xf32>
    %15 = vector.extract_strided_slice %13 {offsets = [128, 0], sizes = [128, 256], strides = [1, 1]} : vector<256x256xf32> to vector<128x256xf32>
    %16 = tpu.iota {dimensions = array<i32: 1>} : vector<4x128xi32>
    %17 = tpu.iota {dimensions = array<i32: 0>} : vector<4x128xi32>
    %c32_i32 = arith.constant 32 : i32
    %18 = vector.broadcast %c32_i32 : i32 to vector<4x128xi32>
    %19 = arith.muli %17, %18 : vector<4x128xi32>
    %20 = arith.cmpi sge, %16, %19 : vector<4x128xi32>
    %c32_i32_14 = arith.constant 32 : i32
    %21 = vector.broadcast %c32_i32_14 : i32 to vector<4x128xi32>
    %22 = arith.addi %19, %21 : vector<4x128xi32>
    %23 = arith.cmpi slt, %16, %22 : vector<4x128xi32>
    %24 = arith.andi %20, %23 : vector<4x128xi1>
    %cst_15 = arith.constant 1.000000e+00 : f32
    %cst_16 = arith.constant 0.000000e+00 : f32
    %25 = vector.broadcast %cst_15 : f32 to vector<4x128xf32>
    %26 = vector.broadcast %cst_16 : f32 to vector<4x128xf32>
    %27 = arith.select %24, %25, %26 : vector<4x128xi1>, vector<4x128xf32>
    %cst_17 = arith.constant 5.000000e-01 : f32
    %28 = vector.broadcast %cst_17 : f32 to vector<4x128xf32>
    %29 = arith.subf %28, %27 : vector<4x128xf32>
    %30 = arith.mulf %8, %14 : vector<128x256xf32>
    %cst_18 = arith.constant dense<0.000000e+00> : vector<4x256xf32>
    %31 = tpu.matmul %29, %30, %cst_18 {dimension_numbers = #tpu.dot_dimension_numbers<[1], [0], [0], [1], [0, 0, 1, 1], [], []>} : vector<4x128xf32>, vector<128x256xf32>, vector<4x256xf32> -> vector<4x256xf32>
    %cst_19 = arith.constant dense<0xFF800000> : vector<256xf32>
    %32 = vector.multi_reduction <maximumf>, %31, %cst_19 [0] : vector<4x256xf32> to vector<256xf32>
    %33 = vector.shape_cast %32 : vector<256xf32> to vector<1x256xf32>
    %34 = vector.broadcast %33 : vector<1x256xf32> to vector<4x256xf32>
    %35 = arith.subf %31, %34 : vector<4x256xf32>
    %36 = math.exp %35 : vector<4x256xf32>
    %cst_20 = arith.constant dense<0.000000e+00> : vector<256xf32>
    %37 = vector.multi_reduction <add>, %36, %cst_20 [0] : vector<4x256xf32> to vector<256xf32>
    %38 = vector.shape_cast %37 : vector<256xf32> to vector<1x256xf32>
    %39 = tpu.reciprocal %38 {approx = true} : vector<1x256xf32> -> vector<1x256xf32>
    %40 = vector.broadcast %39 : vector<1x256xf32> to vector<4x256xf32>
    %41 = arith.mulf %36, %40 : vector<4x256xf32>
    %42 = tpu.iota {dimensions = array<i32: 0>} : vector<128x4xi32>
    %43 = tpu.iota {dimensions = array<i32: 1>} : vector<128x4xi32>
    %c32_i32_21 = arith.constant 32 : i32
    %44 = vector.broadcast %c32_i32_21 : i32 to vector<128x4xi32>
    %45 = arith.muli %43, %44 : vector<128x4xi32>
    %46 = arith.cmpi sge, %42, %45 : vector<128x4xi32>
    %c32_i32_22 = arith.constant 32 : i32
    %47 = vector.broadcast %c32_i32_22 : i32 to vector<128x4xi32>
    %48 = arith.addi %45, %47 : vector<128x4xi32>
    %49 = arith.cmpi slt, %42, %48 : vector<128x4xi32>
    %50 = arith.andi %46, %49 : vector<128x4xi1>
    %cst_23 = arith.constant 1.000000e+00 : f32
    %cst_24 = arith.constant 0.000000e+00 : f32
    %51 = vector.broadcast %cst_23 : f32 to vector<128x4xf32>
    %52 = vector.broadcast %cst_24 : f32 to vector<128x4xf32>
    %53 = arith.select %50, %51, %52 : vector<128x4xi1>, vector<128x4xf32>
    %cst_25 = arith.constant dense<0.000000e+00> : vector<128x256xf32>
    %54 = tpu.matmul %53, %41, %cst_25 {dimension_numbers = #tpu.dot_dimension_numbers<[1], [0], [0], [1], [0, 0, 1, 1], [], []>} : vector<128x4xf32>, vector<4x256xf32>, vector<128x256xf32> -> vector<128x256xf32>
    %55 = arith.mulf %15, %54 : vector<128x256xf32>
    %56 = vector.extract_strided_slice %55 {offsets = [0, 0], sizes = [32, 256], strides = [1, 1]} : vector<128x256xf32> to vector<32x256xf32>
    %57 = vector.extract_strided_slice %55 {offsets = [32, 0], sizes = [32, 256], strides = [1, 1]} : vector<128x256xf32> to vector<32x256xf32>
    %58 = arith.addf %56, %57 : vector<32x256xf32>
    %59 = vector.extract_strided_slice %55 {offsets = [64, 0], sizes = [32, 256], strides = [1, 1]} : vector<128x256xf32> to vector<32x256xf32>
    %60 = arith.addf %58, %59 : vector<32x256xf32>
    %61 = vector.extract_strided_slice %55 {offsets = [96, 0], sizes = [32, 256], strides = [1, 1]} : vector<128x256xf32> to vector<32x256xf32>
    %62 = arith.addf %60, %61 : vector<32x256xf32>
    %63 = arith.addf %62, %1 : vector<32x256xf32>
    %cst_26 = arith.constant 5.000000e-01 : f32
    %64 = vector.broadcast %cst_26 : f32 to vector<32x256xf32>
    %65 = arith.mulf %63, %64 : vector<32x256xf32>
    %c0_27 = arith.constant 0 : index
    %c0_28 = arith.constant 0 : index
    %c0_29 = arith.constant 0 : index
    %66 = vector.load %arg8[%c0_27, %c0_28, %c0_29] : memref<1x32x256xf32, #tpu.memory_space<vmem>>, vector<1x32x256xf32>
    %67 = vector.shape_cast %66 : vector<1x32x256xf32> to vector<32x256xf32>
    %68 = vector.shape_cast %65 : vector<32x256xf32> to vector<1x32x256xf32>
    tpu.vector_store %arg8[%c0_27, %c0_28, %c0_29], %68 {strides = array<i32>} : memref<1x32x256xf32, #tpu.memory_space<vmem>>, vector<1x32x256xf32>,
    return
  }
  func.func @transform_0(%arg0: i32, %arg1: i32) -> (i32, i32, i32) {
    %c0_i32 = arith.constant 0 : i32
    %c0_i32_0 = arith.constant 0 : i32
    return %arg0, %c0_i32, %arg1 : i32, i32, i32
  }
  func.func @transform_1(%arg0: i32, %arg1: i32) -> (i32, i32, i32) {
    %c0_i32 = arith.constant 0 : i32
    %c0_i32_0 = arith.constant 0 : i32
    return %arg0, %c0_i32, %arg1 : i32, i32, i32
  }
  func.func @transform_2(%arg0: i32, %arg1: i32) -> (i32, i32) {
    %c0_i32 = arith.constant 0 : i32
    %c0_i32_0 = arith.constant 0 : i32
    %c0_i32_1 = arith.constant 0 : i32
    return %c0_i32, %c0_i32_0 : i32, i32
  }
  func.func @transform_3(%arg0: i32, %arg1: i32) -> (i32, i32) {
    %c0_i32 = arith.constant 0 : i32
    %c0_i32_0 = arith.constant 0 : i32
    %c0_i32_1 = arith.constant 0 : i32
    return %c0_i32, %c0_i32_0 : i32, i32
  }
  func.func @transform_4(%arg0: i32, %arg1: i32) -> (i32, i32) {
    %c0_i32 = arith.constant 0 : i32
    %c0_i32_0 = arith.constant 0 : i32
    %c0_i32_1 = arith.constant 0 : i32
    return %c0_i32, %c0_i32_0 : i32, i32
  }
  func.func @transform_5(%arg0: i32, %arg1: i32) -> (i32, i32) {
    %c0_i32 = arith.constant 0 : i32
    %c0_i32_0 = arith.constant 0 : i32
    %c0_i32_1 = arith.constant 0 : i32
    return %c0_i32, %c0_i32_0 : i32, i32
  }
  func.func @transform_6(%arg0: i32, %arg1: i32) -> (i32, i32, i32) {
    %c0_i32 = arith.constant 0 : i32
    %c0_i32_0 = arith.constant 0 : i32
    return %arg0, %c0_i32, %arg1 : i32, i32, i32
  }
}

</mosaic_0001>

<bundles_post_ra>
// kernel: clla_forward.1
= control target key start
LH: loop header
LB: loop body
LE: loop exit
PB: predicated region body
PF: predicated region fallthrough
CT: control target
= control target key end

     0   :  { %s2129_s21 = smov 0   ;;  %s2131_s22 = smov 0   ;;  %s2907_s0 = inlined_call_operand.vmem [shape: f32[2,32,256], index: 0, kind: input, shape index: {}]   ;;  %s2908_s1 = inlined_call_operand.vmem [shape: bf16[2,128,256], index: 1, kind: input, shape index: {}]   ;;  %s2909_s2 = inlined_call_operand.vmem [shape: f32[128,32], index: 2, kind: input, shape index: {}]   ;;  %s2910_s3 = inlined_call_operand.vmem [shape: f32[128,1], index: 3, kind: input, shape index: {}]   ;;  %s2911_s4 = inlined_call_operand.vmem [shape: bf16[256,128], index: 4, kind: input, shape index: {}]   ;;  %s2912_s5 = inlined_call_operand.vmem [shape: f32[256,1], index: 5, kind: input, shape index: {}]   ;;  %s2913_s6 = inlined_call_operand.vmem [shape: f32[2,32,256], index: 6, kind: output, shape index: {}]  }
   0x1   :  { %s2133_s23 = smov 0  }
   0x2 LB: > { %s28_s24 = sadd.s32 1, %s2086_s22  ;;  %p1906_p0 = scmp.ge.s32.totalorder %s2090_s23, 1  ;;  %s2090_s23 = sphi %s2133_s23, %s16_s23   ;;  %s2086_s22 = sphi %s2131_s22, %s2994_s22   ;;  %s2082_s21 = sphi %s2129_s21, %s2993_s21  }
   0x3   : > { %p30_p1 = scmp.ge.s32.totalorder %s28_s24, 2  ;;  %p250_p2 = scmp.lt.s32.totalorder %s2090_s23, 3 }
   0x5   : > { %s2996_s24 = smov (%p30_p1, %s28_s24), 0  ;;  %p251_p3 = pnand %p1906_p0, %p250_p2 }
   0x7   : > { %254 = sbr.rel (%p251_p3) target bundleno = 862 (0x35e), region = 44 }
   0xc   : > { %p298_p4 = scmp.lt.s32.totalorder %s2082_s21, 1  ;;  %v2914_v0 = vmov 0.0   ;;  %v2093_v1 = vmov 0   ;;  %v383_v2 = vld [vmem:[%s2910_s3 + $0x78] sm:$0xff]  ;;  %v382_v3 = vld [vmem:[%s2910_s3 + $0x70] sm:$0xff]  ;;  %v352_v23 = vld [vmem:[%s2909_s2] sm:$0xff] }
   0xd   : > { %577 = vmatprep.mubr.f32.mxu0 %v2914_v0  ;;  %1106 = vmatprep.mubr.bf16.mxu1 %v2093_v1  ;;  %v721_v4 = vld [vmem:[%s2912_s5 + $0x78] sm:$0xff]  ;;  %v720_v5 = vld [vmem:[%s2912_s5 + $0x70] sm:$0xff]  ;;  %vm464_vm0 = vcmask 261120   ;;  %v719_v24 = vld [vmem:[%s2912_s5 + $0x68] sm:$0xff]  ;;  %vm1381_vm4 = vcmask 1043456   ;;  %vm1501_vm10 = vcmask 31744  }
   0xe   : > { %s2998_s21 = smov (!%p298_p4, %s2082_s21), 1  ;;  %2011 = vset.pattern.permute.xlu1 %v2093_v1  ;;  %2010 = vset.pattern.permute.xlu0 %v2093_v1  ;;  %v381_v26 = vld [vmem:[%s2910_s3 + $0x68] sm:$0xff]  ;;  %v718_v30 = vld [vmem:[%s2912_s5 + $0x60] sm:$0xff]  ;;  %v354_v33 = vld [vmem:[%s2909_s2 + $0x10] sm:$0xff] }
   0xf   : > { %s1982_s27 = sshll.u32 %s2998_s21, 7  ;;  %461 = vperm.xlu0 %2010, %v383_v2   ;;  %456 = vperm.xlu1 %2011, %v382_v3   ;;  %s1981_s13 = sshll.u32 %s2998_s21, 6  ;;  %v353_v28 = vld [vmem:[%s2909_s2 + $0x8] sm:$0xff]  ;;  %v380_v31 = vld [vmem:[%s2910_s3 + $0x60] sm:$0xff]  ;;  %v717_v34 = vld [vmem:[%s2912_s5 + $0x58] sm:$0xff] }
  0x10   : > { %s2163_s8 = scalar_lea.vmem %s2908_s1, %s1982_s27  ;;  %s2181_s16 = scalar_lea.vmem %s2907_s0, %s1981_s13  ;;  %v379_v36 = vld [vmem:[%s2910_s3 + $0x58] sm:$0xff]  ;;  %v716_v39 = vld [vmem:[%s2912_s5 + $0x50] sm:$0xff]  ;;  %v2036_v42 = vld [vmem:[%s2911_s4] sm:$0xff]  }
  0x11   : > { %v2012_v6 = vld [vmem:[%s2163_s8 + $0x74] ss:$8 sps:$4 sm:$0xff]   ;;  %v2014_v7 = vld [vmem:[%s2163_s8 + $0x70] ss:$8 sps:$4 sm:$0xff]   ;;  %v2015_v8 = vld [vmem:[%s2163_s8 + $0x64] ss:$8 sps:$4 sm:$0xff]  }
  0x12   : > { %1074 = vmatprep.subr.bf16.mxu1 %v2012_v6  ;;  %v2017_v9 = vld [vmem:[%s2163_s8 + $0x60] ss:$8 sps:$4 sm:$0xff]   ;;  %v2018_v10 = vld [vmem:[%s2163_s8 + $0x54] ss:$8 sps:$4 sm:$0xff]   ;;  %v2020_v12 = vld [vmem:[%s2163_s8 + $0x50] ss:$8 sps:$4 sm:$0xff]  }
  0x13   : > { %815 = vperm.xlu0 %2010, %v721_v4   ;;  %1075 = vmatpush1.bf16.msra.mxu1 %v2014_v7  ;;  %v335_v11 = vld [vmem:[%s2181_s16 + $0x38] sm:$0xff]  ;;  %v2021_v13 = vld [vmem:[%s2163_s8 + $0x44] ss:$8 sps:$4 sm:$0xff]   ;;  %v334_v14 = vld [vmem:[%s2181_s16 + $0x30] sm:$0xff] }
  0x14   : > { %810 = vperm.xlu1 %2011, %v720_v5   ;;  %1076 = vmatprep.subr.bf16.mxu1 %v2015_v8  ;;  %v333_v15 = vld [vmem:[%s2181_s16 + $0x28] sm:$0xff]  ;;  %v332_v16 = vld [vmem:[%s2181_s16 + $0x20] sm:$0xff]  ;;  %v331_v17 = vld [vmem:[%s2181_s16 + $0x18] sm:$0xff] }
  0x15   : > { %537 = vmatprep.subr.mxu0 %v335_v11  ;;  %v330_v18 = vld [vmem:[%s2181_s16 + $0x10] sm:$0xff]  ;;  %v2023_v19 = vld [vmem:[%s2163_s8 + $0x40] ss:$8 sps:$4 sm:$0xff]   ;;  %v2027_v27 = vld [vmem:[%s2163_s8 + $0x24] ss:$8 sps:$4 sm:$0xff]  }
  0x16   : > { %538 = vmatpush1.msra.mxu0 %v334_v14  ;;  %v2024_v20 = vld [vmem:[%s2163_s8 + $0x34] ss:$8 sps:$4 sm:$0xff]   ;;  %v329_v21 = vld [vmem:[%s2181_s16 + $0x8] sm:$0xff]  ;;  %v328_v22 = vld [vmem:[%s2181_s16] sm:$0xff] }
  0x17   : > { %1077 = vmatpush1.bf16.msra.mxu1 %v2017_v9  ;;  %539 = vmatprep.subr.mxu0 %v333_v15  ;;  %v2026_v25 = vld [vmem:[%s2163_s8 + $0x30] ss:$8 sps:$4 sm:$0xff]   ;;  %v2029_v29 = vld [vmem:[%s2163_s8 + $0x20] ss:$8 sps:$4 sm:$0xff]   ;;  %v2030_v32 = vld [vmem:[%s2163_s8 + $0x14] ss:$8 sps:$4 sm:$0xff]  }
  0x18   : > { %1078 = vmatprep.subr.bf16.mxu1 %v2018_v10  ;;  %540 = vmatpush1.msra.mxu0 %v332_v16  ;;  %v2032_v35 = vld [vmem:[%s2163_s8 + $0x10] ss:$8 sps:$4 sm:$0xff]   ;;  %v2033_v37 = vld [vmem:[%s2163_s8 + $0x4] ss:$8 sps:$4 sm:$0xff]   ;;  %v2035_v40 = vld [vmem:[%s2163_s8] ss:$8 sps:$4 sm:$0xff]   ;;  %s2872_s8 = scalar_lea.vmem %s2913_s6, %s1981_s13 }
  0x19   : > { %541 = vmatprep.subr.mxu0 %v331_v17  ;;  %805 = vperm.xlu1 %2011, %v719_v24   ;;  %v355_v38 = vld [vmem:[%s2909_s2 + $0x18] sm:$0xff]  ;;  %v378_v41 = vld [vmem:[%s2910_s3 + $0x50] sm:$0xff]  ;;  %v356_v43 = vld [vmem:[%s2909_s2 + $0x20] sm:$0xff] }
  0x1a   : > { %542 = vmatpush1.msra.mxu0 %v330_v18  ;;  %451 = vperm.xlu0 %2010, %v381_v26   ;;  %v715_v44 = vld [vmem:[%s2912_s5 + $0x48] sm:$0xff]  ;;  %v714_v47 = vld [vmem:[%s2912_s5 + $0x40] sm:$0xff]  ;;  %v358_v49 = vld [vmem:[%s2909_s2 + $0x30] sm:$0xff] }
  0x1b   : > { %1079 = vmatpush1.bf16.msra.mxu1 %v2020_v12  ;;  %543 = vmatprep.subr.mxu0 %v329_v21  ;;  %v377_v45 = vld [vmem:[%s2910_s3 + $0x48] sm:$0xff]  ;;  %v376_v48 = vld [vmem:[%s2910_s3 + $0x40] sm:$0xff]  ;;  %v713_v51 = vld [vmem:[%s2912_s5 + $0x38] sm:$0xff] }
  0x1c   : > { %1080 = vmatprep.subr.bf16.mxu1 %v2021_v13  ;;  %544 = vmatpush1.msra.mxu0 %v328_v22  ;;  %v357_v46 = vld [vmem:[%s2909_s2 + $0x28] sm:$0xff]  ;;  %v375_v52 = vld [vmem:[%s2910_s3 + $0x38] sm:$0xff]  ;;  %v712_v54 = vld [vmem:[%s2912_s5 + $0x30] sm:$0xff] }
  0x1d   : > { %1913 = vmatmul.mubr.msk.f32.vlgmr.msra.gmra.mxu0 %vm464_vm0, %v352_v23  ;;  %800 = vperm.xlu1 %2011, %v718_v30   ;;  %v2037_v50 = vld [vmem:[%s2911_s4 + $0x8] sm:$0xff]   ;;  %v359_v53 = vld [vmem:[%s2909_s2 + $0x38] sm:$0xff]  ;;  %v374_v55 = vld [vmem:[%s2910_s3 + $0x30] sm:$0xff] }
  0x1e   : > { %583 = vmatprep.mubr.f32.mxu0 %v2914_v0  ;;  %446 = vperm.xlu0 %2010, %v380_v31   ;;  %v360_v56 = vld [vmem:[%s2909_s2 + $0x40] sm:$0xff]  ;;  %v2038_v57 = vld [vmem:[%s2911_s4 + $0x10] sm:$0xff]   ;;  %v711_v58 = vld [vmem:[%s2912_s5 + $0x28] sm:$0xff] }
  0x1f   : > { %1081 = vmatpush1.bf16.msra.mxu1 %v2023_v19  ;;  %v373_v59 = vld [vmem:[%s2910_s3 + $0x28] sm:$0xff]  ;;  %v710_v61 = vld [vmem:[%s2912_s5 + $0x20] sm:$0xff]  ;;  %v362_v63 = vld [vmem:[%s2909_s2 + $0x50] sm:$0xff] }
  0x20   : > { %1082 = vmatprep.subr.bf16.mxu1 %v2024_v20  ;;  %v361_v60 = vld [vmem:[%s2909_s2 + $0x48] sm:$0xff]  ;;  %v372_v62 = vld [vmem:[%s2910_s3 + $0x20] sm:$0xff]  ;;  %v2039_v2 = vld [vmem:[%s2911_s4 + $0x18] sm:$0xff]  }
  0x21   : > { %1914 = vmatmul.mubr.msk.f32.gmra.mxu0 %vm464_vm0, %v353_v28  ;;  %795 = vperm.xlu1 %2011, %v717_v34   ;;  %v709_v3 = vld [vmem:[%s2912_s5 + $0x18] sm:$0xff]  ;;  %v708_v6 = vld [vmem:[%s2912_s5 + $0x10] sm:$0xff]  ;;  %v364_v8 = vld [vmem:[%s2909_s2 + $0x60] sm:$0xff] }
  0x22   : > { %589 = vmatprep.mubr.f32.mxu0 %v2914_v0  ;;  %441 = vperm.xlu0 %2010, %v379_v36   ;;  %v371_v4 = vld [vmem:[%s2910_s3 + $0x18] sm:$0xff]  ;;  %v370_v7 = vld [vmem:[%s2910_s3 + $0x10] sm:$0xff]  ;;  %v2040_v9 = vld [vmem:[%s2911_s4 + $0x20] sm:$0xff]  }
  0x23   : > { %1083 = vmatpush1.bf16.msra.mxu1 %v2026_v25  ;;  %v363_v5 = vld [vmem:[%s2909_s2 + $0x58] sm:$0xff]  ;;  %v707_v10 = vld [vmem:[%s2912_s5 + $0x8] sm:$0xff]  ;;  %v706_v13 = vld [vmem:[%s2912_s5] sm:$0xff] }
  0x24   : > { %1084 = vmatprep.subr.bf16.mxu1 %v2027_v27  ;;  %v369_v11 = vld [vmem:[%s2910_s3 + $0x8] sm:$0xff]  ;;  %v368_v14 = vld [vmem:[%s2910_s3] sm:$0xff]  ;;  %v366_v15 = vld [vmem:[%s2909_s2 + $0x70] sm:$0xff] }
  0x25   : > { %1915 = vmatmul.mubr.msk.f32.gmra.mxu0 %vm464_vm0, %v354_v33  ;;  %790 = vperm.xlu1 %2011, %v716_v39   ;;  %v365_v12 = vld [vmem:[%s2909_s2 + $0x68] sm:$0xff]  ;;  %v722_v18 = vld [vmem:[%s2912_s5 + $0x80] sm:$0xff]  ;;  %v367_v19 = vld [vmem:[%s2909_s2 + $0x78] sm:$0xff] }
  0x26   : > { %595 = vmatprep.mubr.f32.mxu0 %v2914_v0  ;;  %436 = vperm.xlu0 %2010, %v378_v41   ;;  %v2041_v16 = vld [vmem:[%s2911_s4 + $0x28] sm:$0xff]   ;;  %v725_v20 = vld [vmem:[%s2912_s5 + $0x98] sm:$0xff]  ;;  %v724_v21 = vld [vmem:[%s2912_s5 + $0x90] sm:$0xff] }
  0x27   : > { %1085 = vmatpush1.bf16.msra.mxu1 %v2029_v29  ;;  %v723_v17 = vld [vmem:[%s2912_s5 + $0x88] sm:$0xff]  ;;  %v2042_v22 = vld [vmem:[%s2911_s4 + $0x30] sm:$0xff]   ;;  %v726_v24 = vld [vmem:[%s2912_s5 + $0xa0] sm:$0xff] }
  0x28   : > { %1086 = vmatprep.subr.bf16.mxu1 %v2030_v32  ;;  %v727_v23 = vld [vmem:[%s2912_s5 + $0xa8] sm:$0xff]  ;;  %v729_v25 = vld [vmem:[%s2912_s5 + $0xb8] sm:$0xff]  ;;  %v728_v26 = vld [vmem:[%s2912_s5 + $0xb0] sm:$0xff] }
  0x29   : > { %1916 = vmatmul.mubr.msk.f32.gmra.mxu0 %vm464_vm0, %v355_v38  ;;  %785 = vperm.xlu1 %2011, %v715_v44   ;;  %v2043_v27 = vld [vmem:[%s2911_s4 + $0x38] sm:$0xff]   ;;  %v731_v28 = vld [vmem:[%s2912_s5 + $0xc8] sm:$0xff]  ;;  %v730_v29 = vld [vmem:[%s2912_s5 + $0xc0] sm:$0xff] }
  0x2a   : > { %601 = vmatprep.mubr.f32.mxu0 %v2914_v0  ;;  %431 = vperm.xlu0 %2010, %v377_v45   ;;  %v733_v30 = vld [vmem:[%s2912_s5 + $0xd8] sm:$0xff]  ;;  %v732_v31 = vld [vmem:[%s2912_s5 + $0xd0] sm:$0xff]  ;;  %v2044_v32 = vld [vmem:[%s2911_s4 + $0x40] sm:$0xff]  }
  0x2b   : > { %1087 = vmatpush1.bf16.msra.mxu1 %v2032_v35  ;;  %v735_v33 = vld [vmem:[%s2912_s5 + $0xe8] sm:$0xff]  ;;  %v734_v34 = vld [vmem:[%s2912_s5 + $0xe0] sm:$0xff]  ;;  %v737_v35 = vld [vmem:[%s2912_s5 + $0xf8] sm:$0xff] }
  0x2c   : > { %1088 = vmatprep.subr.bf16.mxu1 %v2033_v37  ;;  %v736_v36 = vld [vmem:[%s2912_s5 + $0xf0] sm:$0xff]  ;;  %v2045_v37 = vld [vmem:[%s2911_s4 + $0x48] sm:$0xff]   ;;  %v2047_v39 = vld [vmem:[%s2911_s4 + $0x58] sm:$0xff]  }
  0x2d   : > { %1917 = vmatmul.mubr.msk.f32.gmra.mxu0 %vm464_vm0, %v356_v43  ;;  %780 = vperm.xlu1 %2011, %v714_v47   ;;  %v2046_v38 = vld [vmem:[%s2911_s4 + $0x50] sm:$0xff]  }
  0x2e   : > { %607 = vmatprep.mubr.f32.mxu0 %v2914_v0  ;;  %426 = vperm.xlu0 %2010, %v376_v48  }
  0x2f   : > { %1089 = vmatpush1.bf16.msra.mxu1 %v2035_v40  ;;  %v2048_v40 = vld [vmem:[%s2911_s4 + $0x60] sm:$0xff]  }
  0x31   : > { %1918 = vmatmul.mubr.msk.f32.gmra.mxu0 %vm464_vm0, %v357_v46  ;;  %775 = vperm.xlu1 %2011, %v713_v51   ;;  %v2050_v46 = vld [vmem:[%s2911_s4 + $0x70] sm:$0xff]  }
  0x32   : > { %1107 = vmatmul.mubr.bf16.vlgmr.msra.gmra.mxu1 %v2036_v42  ;;  %613 = vmatprep.mubr.f32.mxu0 %v2914_v0  ;;  %v2049_v42 = vld [vmem:[%s2911_s4 + $0x68] sm:$0xff]  }
  0x33   : > { %1116 = vmatprep.mubr.bf16.mxu1 %v2093_v1  ;;  %421 = vperm.xlu0 %2010, %v375_v52  }
  0x35   : > { %1919 = vmatmul.mubr.msk.f32.gmra.mxu0 %vm464_vm0, %v358_v49  ;;  %770 = vperm.xlu1 %2011, %v712_v54   ;;  %v2051_v49 = vld [vmem:[%s2911_s4 + $0x78] sm:$0xff]  }
  0x36   : > { %619 = vmatprep.mubr.f32.mxu0 %v2914_v0 }
  0x37   : > { %416 = vperm.xlu0 %2010, %v374_v55  }
  0x39   : > { %1920 = vmatmul.mubr.msk.f32.gmra.mxu0 %vm464_vm0, %v359_v53  ;;  %765 = vperm.xlu1 %2011, %v711_v58  }
  0x3a   : > { %1117 = vmatmul.mubr.bf16.gmra.mxu1 %v2037_v50  ;;  %625 = vmatprep.mubr.f32.mxu0 %v2914_v0 }
  0x3b   : > { %1126 = vmatprep.mubr.bf16.mxu1 %v2093_v1  ;;  %411 = vperm.xlu0 %2010, %v373_v59  }
  0x3d   : > { %1921 = vmatmul.mubr.msk.f32.gmra.mxu0 %vm464_vm0, %v360_v56  ;;  %760 = vperm.xlu1 %2011, %v710_v61  }
  0x3e   : > { %631 = vmatprep.mubr.f32.mxu0 %v2914_v0 }
  0x3f   : > { %406 = vperm.xlu0 %2010, %v372_v62  }
  0x41   : > { %1922 = vmatmul.mubr.msk.f32.gmra.mxu0 %vm464_vm0, %v361_v60  ;;  %755 = vperm.xlu1 %2011, %v709_v3  }
  0x42   : > { %1127 = vmatmul.mubr.bf16.gmra.mxu1 %v2038_v57  ;;  %637 = vmatprep.mubr.f32.mxu0 %v2914_v0 }
  0x43   : > { %1136 = vmatprep.mubr.bf16.mxu1 %v2093_v1  ;;  %401 = vperm.xlu0 %2010, %v371_v4  }
  0x45   : > { %1923 = vmatmul.mubr.msk.f32.gmra.mxu0 %vm464_vm0, %v362_v63  ;;  %750 = vperm.xlu1 %2011, %v708_v6  }
  0x46   : > { %643 = vmatprep.mubr.f32.mxu0 %v2914_v0 }
  0x47   : > { %396 = vperm.xlu0 %2010, %v370_v7  }
  0x49   : > { %1924 = vmatmul.mubr.msk.f32.gmra.mxu0 %vm464_vm0, %v363_v5  ;;  %745 = vperm.xlu1 %2011, %v707_v10  }
  0x4a   : > { %1137 = vmatmul.mubr.bf16.gmra.mxu1 %v2039_v2  ;;  %649 = vmatprep.mubr.f32.mxu0 %v2914_v0 }
  0x4b   : > { %1146 = vmatprep.mubr.bf16.mxu1 %v2093_v1  ;;  %391 = vperm.xlu0 %2010, %v369_v11  }
  0x4d   : > { %1925 = vmatmul.mubr.msk.f32.gmra.mxu0 %vm464_vm0, %v364_v8  ;;  %740 = vperm.xlu1 %2011, %v706_v13  }
  0x4e   : > { %655 = vmatprep.mubr.f32.mxu0 %v2914_v0 }
  0x4f   : > { %386 = vperm.xlu0 %2010, %v368_v14  }
  0x51   : > { %1926 = vmatmul.mubr.msk.f32.gmra.mxu0 %vm464_vm0, %v365_v12  ;;  %825 = vperm.xlu1 %2011, %v723_v17  }
  0x52   : > { %1147 = vmatmul.mubr.bf16.gmra.mxu1 %v2040_v9  ;;  %661 = vmatprep.mubr.f32.mxu0 %v2914_v0 }
  0x53   : > { %1156 = vmatprep.mubr.bf16.mxu1 %v2093_v1  ;;  %820 = vperm.xlu0 %2010, %v722_v18  }
  0x55   : > { %1927 = vmatmul.mubr.msk.f32.gmra.mxu0 %vm464_vm0, %v366_v15  ;;  %835 = vperm.xlu1 %2011, %v725_v20  }
  0x56   : > { %667 = vmatprep.mubr.f32.mxu0 %v2914_v0 }
  0x57   : > { %830 = vperm.xlu0 %2010, %v724_v21  }
  0x59   : > { %1928 = vmatmul.mubr.msk.f32.gmra.mxu0 %vm464_vm0, %v367_v19  ;;  %845 = vperm.xlu1 %2011, %v727_v23  }
  0x5a   : > { %1157 = vmatmul.mubr.bf16.gmra.mxu1 %v2041_v16  ;;  %1374 = vmatprep.mubr.f32.mxu0 %v2914_v0 }
  0x5b   : > { %1166 = vmatprep.mubr.bf16.mxu1 %v2093_v1  ;;  %840 = vperm.xlu0 %2010, %v726_v24  }
  0x5d   : > { %855 = vperm.xlu1 %2011, %v729_v25  }
  0x5f   : > { %850 = vperm.xlu0 %2010, %v728_v26  }
  0x61   : > { %865 = vperm.xlu1 %2011, %v731_v28  }
  0x62   : > { %1167 = vmatmul.mubr.bf16.gmra.mxu1 %v2042_v22 }
  0x63   : > { %1176 = vmatprep.mubr.bf16.mxu1 %v2093_v1  ;;  %860 = vperm.xlu0 %2010, %v730_v29  }
  0x65   : > { %875 = vperm.xlu1 %2011, %v733_v30  }
  0x67   : > { %870 = vperm.xlu0 %2010, %v732_v31  }
  0x69   : > { %885 = vperm.xlu1 %2011, %v735_v33  }
  0x6a   : > { %1177 = vmatmul.mubr.bf16.gmra.mxu1 %v2043_v27 }
  0x6b   : > { %1186 = vmatprep.mubr.bf16.mxu1 %v2093_v1  ;;  %880 = vperm.xlu0 %2010, %v734_v34  }
  0x6d   : > { %895 = vperm.xlu1 %2011, %v737_v35  }
  0x6f   : > { %890 = vperm.xlu0 %2010, %v736_v36  }
  0x72   : > { %1187 = vmatmul.mubr.bf16.gmra.mxu1 %v2044_v32 }
  0x73   : > { %1196 = vmatprep.mubr.bf16.mxu1 %v2093_v1 }
  0x7a   : > { %1197 = vmatmul.mubr.bf16.gmra.mxu1 %v2045_v37 }
  0x7b   : > { %1206 = vmatprep.mubr.bf16.mxu1 %v2093_v1 }
  0x82   : > { %1207 = vmatmul.mubr.bf16.gmra.mxu1 %v2046_v38 }
  0x83   : > { %1216 = vmatprep.mubr.bf16.mxu1 %v2093_v1 }
  0x8a   : > { %1217 = vmatmul.mubr.bf16.gmra.mxu1 %v2047_v39  ;;  %v2467_v41 = vpop.permute.xlu0 %461  ;;  %v2472_v43 = vpop.permute.xlu1 %456 }
  0x8b   : > { %1226 = vmatprep.mubr.bf16.mxu1 %v2093_v1 }
  0x8e   : > { %v2474_v44 = vpop.permute.xlu0 %815 }
  0x8f   : > { %v2477_v45 = vpop.permute.xlu1 %810 }
  0x92   : > { %1227 = vmatmul.mubr.bf16.gmra.mxu1 %v2048_v40 }
  0x93   : > { %1236 = vmatprep.mubr.bf16.mxu1 %v2093_v1 }
  0x94   : > { %v2484_v48 = vpop.permute.xlu1 %805 }
  0x95   : > { %v2482_v47 = vpop.permute.xlu0 %451 }
  0x98   : > { %v2492_v51 = vpop.permute.xlu1 %800 }
  0x99   : > { %v2490_v50 = vpop.permute.xlu0 %446 }
  0x9a   : > { %1237 = vmatmul.mubr.bf16.gmra.mxu1 %v2049_v42 }
  0x9b   : > { %1246 = vmatprep.mubr.bf16.mxu1 %v2093_v1 }
  0x9c   : > { %v2496_v53 = vpop.permute.xlu1 %795 }
  0x9d   : > { %v2494_v52 = vpop.permute.xlu0 %441 }
  0xa0   : > { %v2500_v55 = vpop.permute.xlu1 %790 }
  0xa1   : > { %v2498_v54 = vpop.permute.xlu0 %436 }
  0xa2   : > { %1247 = vmatmul.mubr.bf16.gmra.mxu1 %v2050_v46 }
  0xa3   : > { %1256 = vmatprep.mubr.bf16.mxu1 %v2093_v1 }
  0xa4   : > { %v2504_v1 = vpop.permute.xlu1 %785 }
  0xa5   : > { %v2502_v56 = vpop.permute.xlu0 %431 }
  0xa8   : > { %v2508_v58 = vpop.permute.xlu1 %780 }
  0xa9   : > { %v2506_v57 = vpop.permute.xlu0 %426 }
  0xaa   : > { %1257 = vmatmul.mubr.bf16.gmra.mxu1 %v2051_v49 }
  0xac   : > { %v2512_v60 = vpop.permute.xlu1 %775 }
  0xae   : > { %v2510_v59 = vpop.permute.xlu0 %421 }
  0xb0   : > { %v2516_v62 = vpop.permute.xlu1 %770 }
  0xb1   : > { %2921 = vst [vmem:[#allocation3_spill] sm:$0xff] %v2516_v62 }
  0xb2   : > { %v2514_v61 = vpop.permute.xlu0 %416 }
  0xb3   : > { %2920 = vst [vmem:[#allocation2_spill] sm:$0xff] %v2514_v61 }
  0xb4   : > { %v2520_v2 = vpop.permute.xlu1 %765 }
  0xb5   : > { %2923 = vst [vmem:[#allocation5_spill] sm:$0xff] %v2520_v2 }
  0xb6   : > { %v2518_v63 = vpop.permute.xlu0 %411 }
  0xb7   : > { %2922 = vst [vmem:[#allocation4_spill] sm:$0xff] %v2518_v63 }
  0xb8   : > { %v2524_v4 = vpop.permute.xlu1 %760 }
  0xba   : > { %v2522_v3 = vpop.permute.xlu0 %406 }
  0xbc   : > { %v756_v6 = vpop.permute.xlu1 %755 }
  0xbe   : > { %v402_v5 = vpop.permute.xlu0 %401 }
  0xc0   : > { %v751_v10 = vpop.permute.xlu1 %750 }
  0xc2   : > { %v397_v8 = vpop.permute.xlu0 %396 }
  0xc4   : > { %v746_v15 = vpop.permute.xlu1 %745 }
  0xc6   : > { %v392_v13 = vpop.permute.xlu0 %391 }
  0xc8   : > { %v741_v20 = vpop.permute.xlu1 %740 }
  0xca   : > { %v387_v18 = vpop.permute.xlu0 %386 }
  0xdd   : > { %v579_v7 = vpop.f32.mrf.mxu0 }
  0xde   : > { %v580_v22 = vadd.f32 %v579_v7, %v387_v18 }
  0xdf   : > { %v581_v9 = vpop.f32.mrf.mxu0 }
  0xe0   : > { %v582_v28 = vadd.f32 %v581_v9, %v387_v18 }
  0xe1   : > { %v585_v11 = vpop.f32.mrf.mxu0 }
  0xe2   : > { %v586_v29 = vadd.f32 %v585_v11, %v392_v13 }
  0xe3   : > { %v587_v12 = vpop.f32.mrf.mxu0 }
  0xe4   : > { %v588_v38 = vadd.f32 %v587_v12, %v392_v13 }
  0xe5   : > { %v591_v14 = vpop.f32.mrf.mxu0 }
  0xe6   : > { %v592_v39 = vadd.f32 %v591_v14, %v397_v8 }
  0xe7   : > { %v593_v16 = vpop.f32.mrf.mxu0 }
  0xe9   : > { %v597_v17 = vpop.f32.mrf.mxu0 }
  0xeb   : > { %v599_v19 = vpop.f32.mrf.mxu0 }
  0xed   : > { %v603_v21 = vpop.f32.mrf.mxu0 }
  0xef   : > { %v605_v24 = vpop.f32.mrf.mxu0 }
  0xf1   : > { %v2526_v27 = vpop.f32.mrf.mxu0 }
  0xf2   : > { %v1108_v23 = vpop.f32.mrf.mxu1  ;;  %2924 = vst [vmem:[#allocation6_spill] sm:$0xff] %v2526_v27 }
  0xf3   : > { %v1109_v25 = vadd.f32 %v1108_v23, %v741_v20  ;;  %v2530_v33 = vpop.f32.mrf.mxu0 }
  0xf4   : > { %v1110_v26 = vpop.f32.mrf.mxu1  ;;  %2926 = vst [vmem:[#allocation8_spill] sm:$0xff] %v2530_v33 }
  0xf5   : > { %v2528_v30 = vmul.f32 %v1109_v25, %v580_v22  ;;  %v1111_v31 = vadd.f32 %v1110_v26, %v741_v20  ;;  %v2534_v37 = vpop.f32.mrf.mxu0  ;;  %v594_v20 = vadd.f32 %v593_v16, %v397_v8  ;;  %v598_v22 = vadd.f32 %v597_v17, %v402_v5 }
  0xf6   : > { %v1112_v32 = vpop.f32.mrf.mxu1  ;;  %2928 = vst [vmem:[#allocation10_spill] sm:$0xff] %v2534_v37 }
  0xf7   : > { %2925 = vst [vmem:[#allocation7_spill] sm:$0xff] %v2528_v30  ;;  %v2532_v34 = vmul.f32 %v1111_v31, %v582_v28  ;;  %v1113_v35 = vadd.f32 %v1112_v32, %v746_v15  ;;  %v2538_v49 = vpop.f32.mrf.mxu0  ;;  %v604_v31 = vadd.f32 %v603_v21, %v2522_v3 }
  0xf8   : > { %v1114_v36 = vpop.f32.mrf.mxu1  ;;  %2930 = vst [vmem:[#allocation12_spill] sm:$0xff] %v2538_v49 }
  0xf9   : > { %2927 = vst [vmem:[#allocation9_spill] sm:$0xff] %v2532_v34  ;;  %v2536_v40 = vmul.f32 %v1113_v35, %v586_v29  ;;  %v1115_v42 = vadd.f32 %v1114_v36, %v746_v15  ;;  %v2542_v18 = vpop.f32.mrf.mxu0  ;;  %v600_v29 = vadd.f32 %v599_v19, %v402_v5 }
  0xfa   : > { %v1118_v46 = vpop.f32.mrf.mxu1 }
  0xfb   : > { %2929 = vst [vmem:[#allocation11_spill] sm:$0xff] %v2536_v40  ;;  %v2540_v7 = vmul.f32 %v1115_v42, %v588_v38  ;;  %v1119_v9 = vadd.f32 %v1118_v46, %v751_v10  ;;  %v2546_v12 = vpop.f32.mrf.mxu0 }
  0xfc   : > { %v1120_v11 = vpop.f32.mrf.mxu1  ;;  %2933 = vst [vmem:[#allocation15_spill] sm:$0xff] %v2546_v12 }
  0xfd   : > { %2931 = vst [vmem:[#allocation13_spill] sm:$0xff] %v2540_v7  ;;  %v2544_v23 = vmul.f32 %v1119_v9, %v592_v39  ;;  %v1121_v25 = vadd.f32 %v1120_v11, %v751_v10  ;;  %v2550_v28 = vpop.f32.mrf.mxu0  ;;  %v606_v39 = vadd.f32 %v605_v24, %v2522_v3 }
  0xfe   : > { %v1122_v26 = vpop.f32.mrf.mxu1 }
  0xff   : > { %2932 = vst [vmem:[#allocation14_spill] sm:$0xff] %v2544_v23  ;;  %v2548_v13 = vmul.f32 %v1121_v25, %v594_v20  ;;  %v1123_v14 = vadd.f32 %v1122_v26, %v756_v6  ;;  %v2555_v16 = vpop.f32.mrf.mxu0 }
 0x100   : > { %v1124_v15 = vpop.f32.mrf.mxu1 }
 0x101   : > { %2934 = vst [vmem:[#allocation16_spill] sm:$0xff] %v2548_v13  ;;  %v2553_v32 = vmul.f32 %v1123_v14, %v598_v22  ;;  %v1125_v35 = vadd.f32 %v1124_v15, %v756_v6  ;;  %v2560_v38 = vpop.f32.mrf.mxu0 }
 0x102   : > { %v1128_v8 = vpop.f32.mrf.mxu1 }
 0x103   : > { %2935 = vst [vmem:[#allocation17_spill] sm:$0xff] %v2553_v32  ;;  %v2557_v17 = vmul.f32 %v1125_v35, %v600_v29  ;;  %v1129_v10 = vadd.f32 %v1128_v8, %v2524_v4  ;;  %v2568_v21 = vpop.f32.mrf.mxu0 }
 0x104   : > { %v1130_v36 = vpop.f32.mrf.mxu1 }
 0x105   : > { %2936 = vst [vmem:[#allocation18_spill] sm:$0xff] %v2557_v17  ;;  %v2563_v42 = vmul.f32 %v1129_v10, %v604_v31  ;;  %v1131_v5 = vadd.f32 %v1130_v36, %v2524_v4  ;;  %v2574_v9 = vpop.f32.mrf.mxu0 }
 0x106   : > { %v2566_v19 = vpop.f32.mrf.mxu1 }
 0x107   : > { %2937 = vst [vmem:[#allocation19_spill] sm:$0xff] %v2563_v42  ;;  %2938 = vst [vmem:[#allocation20_spill] sm:$0xff] %v2566_v19  ;;  %v2570_v6 = vmul.f32 %v1131_v5, %v606_v39  ;;  %v2578_v20 = vpop.f32.mrf.mxu0 }
 0x108   : > { %v2572_v46 = vpop.f32.mrf.mxu1 }
 0x109   : > { %2939 = vst [vmem:[#allocation21_spill] sm:$0xff] %v2570_v6  ;;  %2940 = vst [vmem:[#allocation22_spill] sm:$0xff] %v2572_v46  ;;  %v645_v3 = vpop.f32.mrf.mxu0 }
 0x10a   : > { %v2576_v11 = vpop.f32.mrf.mxu1 }
 0x10b   : > { %2941 = vst [vmem:[#allocation23_spill] sm:$0xff] %v2576_v11  ;;  %v647_v4 = vpop.f32.mrf.mxu0 }
 0x10c   : > { %v2580_v22 = vpop.f32.mrf.mxu1 }
 0x10d   : > { %2942 = vst [vmem:[#allocation24_spill] sm:$0xff] %v2580_v22  ;;  %v651_v14 = vpop.f32.mrf.mxu0 }
 0x10e   : > { %v2582_v24 = vpop.f32.mrf.mxu1 }
 0x10f   : > { %2943 = vst [vmem:[#allocation25_spill] sm:$0xff] %v2582_v24  ;;  %v653_v31 = vpop.f32.mrf.mxu0 }
 0x110   : > { %v2584_v25 = vpop.f32.mrf.mxu1 }
 0x111   : > { %v657_v10 = vpop.f32.mrf.mxu0 }
 0x112   : > { %v2586_v26 = vpop.f32.mrf.mxu1 }
 0x113   : > { %v659_v5 = vpop.f32.mrf.mxu0 }
 0x114   : > { %v2588_v15 = vpop.f32.mrf.mxu1 }
 0x115   : > { %v663_v34 = vpop.f32.mrf.mxu0 }
 0x116   : > { %v2590_v29 = vpop.f32.mrf.mxu1  ;;  %v664_v62 = vadd.f32 %v663_v34, %v2472_v43 }
 0x117   : > { %v665_v23 = vpop.f32.mrf.mxu0 }
 0x118   : > { %v1154_v35 = vpop.f32.mrf.mxu1  ;;  %v666_v37 = vadd.f32 %v665_v23, %v2472_v43 }
 0x119   : > { %v669_v32 = vpop.f32.mrf.mxu0 }
 0x11a   : > { %v1158_v8 = vpop.f32.mrf.mxu1  ;;  %v670_v49 = vadd.f32 %v669_v32, %v2467_v41  ;;  %v628_v32 = vadd.f32 %v2550_v28, %v2506_v57  ;;  %v2944_v28 = vld [vmem:[#allocation25_spill] sm:$0xff] }
 0x11b   : > { %v671_v6 = vpop.f32.mrf.mxu0 }
 0x11c   : > { %v1160_v36 = vpop.f32.mrf.mxu1  ;;  %v672_v63 = vadd.f32 %v671_v6, %v2467_v41  ;;  %v660_v6 = vadd.f32 %v659_v5, %v2482_v47  ;;  %v658_v41 = vadd.f32 %v657_v10, %v2482_v47  ;;  %v2954_v10 = vld [vmem:[#allocation4_spill] sm:$0xff] }
 0x11d   : > { %v1161_v47 = vadd.f32 %v1160_v36, %v2500_v55  ;;  %v2955_v36 = vld [vmem:[#allocation6_spill] sm:$0xff]  ;;  %v2956_v5 = vld [vmem:[#allocation20_spill] sm:$0xff] }
 0x11e   : > { %v1162_v39 = vpop.f32.mrf.mxu1 }
 0x120   : > { %v1164_v0 = vpop.f32.mrf.mxu1 }
 0x122   : > { %v1168_v30 = vpop.f32.mrf.mxu1 }
 0x124   : > { %v1170_v40 = vpop.f32.mrf.mxu1 }
 0x126   : > { %v1172_v7 = vpop.f32.mrf.mxu1 }
 0x128   : > { %v1174_v13 = vpop.f32.mrf.mxu1 }
 0x129   : > { %v1175_v61 = vadd.f32 %v1174_v13, %v2484_v48 }
 0x12a   : > { %v1178_v17 = vpop.f32.mrf.mxu1 }
 0x12b   : > { %v1179_v11 = vadd.f32 %v1178_v17, %v2477_v45  ;;  %v1305_v43 = vmul.f32 %v1175_v61, %v660_v6 }
 0x12c   : > { %v1180_v42 = vpop.f32.mrf.mxu1 }
 0x12d   : > { %v1181_v46 = vadd.f32 %v1180_v42, %v2477_v45  ;;  %v1171_v42 = vadd.f32 %v1170_v40, %v2492_v51  ;;  %v1306_v45 = vmul.f32 %v1179_v11, %v664_v62  ;;  %v648_v40 = vadd.f32 %v647_v4, %v2494_v52  ;;  %v2949_v4 = vld [vmem:[#allocation10_spill] sm:$0xff] }
 0x12e   : > { %v1182_v33 = vpop.f32.mrf.mxu1  ;;  %v646_v62 = vadd.f32 %v645_v3, %v2494_v52  ;;  %v1143_v11 = vadd.f32 %v2944_v28, %v2512_v60 }
 0x12f   : > { %v1183_v19 = vadd.f32 %v1182_v33, %v2474_v44  ;;  %v1173_v33 = vadd.f32 %v1172_v7, %v2484_v48  ;;  %v1307_v24 = vmul.f32 %v1181_v46, %v666_v37  ;;  %v652_v48 = vadd.f32 %v651_v14, %v2490_v50 }
 0x130   : > { %v1184_v27 = vpop.f32.mrf.mxu1  ;;  %v1267_v37 = vlaneseq  ;;  %v1153_v7 = vadd.f32 %v2590_v29, %v2504_v1  ;;  %v2952_v29 = vld [vmem:[#allocation5_spill] sm:$0xff] }
 0x131   : > { %v1185_v2 = vadd.f32 %v1184_v27, %v2474_v44  ;;  %v1308_v12 = vmul.f32 %v1183_v19, %v670_v49  ;;  %v1169_v44 = vadd.f32 %v1168_v30, %v2492_v51  ;;  %v654_v27 = vadd.f32 %v653_v31, %v2490_v50  ;;  %v2953_v31 = vld [vmem:[#allocation22_spill] sm:$0xff] }
 0x132   : > { %v1304_v34 = vmul.f32 %v1173_v33, %v658_v41  ;;  %v1159_v30 = vadd.f32 %v1158_v8, %v2500_v55  ;;  %v642_v50 = vadd.f32 %v2578_v20, %v2498_v54  ;;  %v640_v49 = vadd.f32 %v2574_v9, %v2498_v54  ;;  %v2957_v41 = vld [vmem:[#allocation8_spill] sm:$0xff] }
 0x133   : > { %v1309_v22 = vmul.f32 %v1185_v2, %v672_v63  ;;  %v1165_v63 = vadd.f32 %v1164_v0, %v2496_v53  ;;  %v1163_v2 = vadd.f32 %v1162_v39, %v2496_v53  ;;  %v1303_v51 = vmul.f32 %v1171_v42, %v654_v27 }
 0x134   : > { %v1302_v0 = vmul.f32 %v1169_v44, %v652_v48  ;;  %v1155_v53 = vadd.f32 %v1154_v35, %v2504_v1  ;;  %v2621_v52 = vshrl.u32 %v1267_v37, 7  ;;  %v636_v55 = vadd.f32 %v2568_v21, %v2502_v56  ;;  %v2958_v48 = vld [vmem:[#allocation21_spill] sm:$0xff] }
 0x135   : > { %1310 = vmatprep.subr.mxu0 %v1309_v22  ;;  %v1301_v61 = vmul.f32 %v1165_v63, %v648_v40  ;;  %v1300_v23 = vmul.f32 %v1163_v2, %v646_v62  ;;  %v1299_v13 = vmul.f32 %v1161_v47, %v642_v50  ;;  %v634_v54 = vadd.f32 %v2560_v38, %v2502_v56  ;;  %v2945_v38 = vld [vmem:[#allocation15_spill] sm:$0xff]  ;;  %v2964_v62 = vld [vmem:[#allocation14_spill] sm:$0xff] }
 0x136   : > { %1311 = vmatpush1.msra.mxu0 %v1308_v12  ;;  %v1151_v12 = vadd.f32 %v2588_v15, %v2508_v58  ;;  %v1149_v1 = vadd.f32 %v2586_v26, %v2508_v58  ;;  %v1298_v17 = vmul.f32 %v1159_v30, %v640_v49  ;;  %v630_v19 = vadd.f32 %v2555_v16, %v2506_v57  ;;  %v2946_v22 = vld [vmem:[#allocation3_spill] sm:$0xff]  ;;  %v2947_v57 = vld [vmem:[#allocation24_spill] sm:$0xff]  ;;  %v2965_v30 = vld [vmem:[#allocation13_spill] sm:$0xff] }
 0x137   : > { %1312 = vmatprep.subr.mxu0 %v1307_v24  ;;  %v1145_v21 = vadd.f32 %v2584_v25, %v2512_v60  ;;  %v1297_v46 = vmul.f32 %v1155_v53, %v636_v55  ;;  %v622_v9 = vadd.f32 %v2542_v18, %v2510_v59  ;;  %v1296_v56 = vmul.f32 %v1153_v7, %v634_v54  ;;  %v2948_v24 = vld [vmem:[#allocation2_spill] sm:$0xff]  ;;  %v2950_v18 = vld [vmem:[#allocation23_spill] sm:$0xff]  ;;  %v2951_v60 = vld [vmem:[#allocation12_spill] sm:$0xff] }
 0x138   : > { %1313 = vmatpush1.msra.mxu0 %v1306_v45  ;;  %v1271_v58 = vmul.u32 32, %v2621_v52  ;;  %v624_v20 = vadd.f32 %v2945_v38, %v2510_v59  ;;  %v1141_v16 = vadd.f32 %v2947_v57, %v2946_v22  ;;  %v1295_v3 = vmul.f32 %v1151_v12, %v630_v19  ;;  %v2959_v2 = vld [vmem:[#allocation19_spill] sm:$0xff]  ;;  %v2967_v53 = vld [vmem:[#allocation9_spill] sm:$0xff] }
 0x139   : > { %1314 = vmatprep.subr.mxu0 %v1305_v43  ;;  %v616_v25 = vadd.f32 %v2949_v4, %v2948_v24  ;;  %v1139_v26 = vadd.f32 %v2950_v18, %v2946_v22  ;;  %v1294_v14 = vmul.f32 %v1149_v1, %v628_v32  ;;  %v618_v15 = vadd.f32 %v2951_v60, %v2948_v24  ;;  %v2966_v50 = vld [vmem:[#allocation11_spill] sm:$0xff] }
 0x13a   : > { %1315 = vmatpush1.msra.mxu0 %v1304_v34  ;;  %v1135_v35 = vadd.f32 %v2953_v31, %v2952_v29  ;;  %v1293_v59 = vmul.f32 %v1145_v21, %v624_v20  ;;  %v2654_v8 = vand.u32 127, %v1267_v37  ;;  %v610_v39 = vadd.f32 %v2955_v36, %v2954_v10  ;;  %v2960_v34 = vld [vmem:[#allocation18_spill] sm:$0xff]  ;;  %v2961_v37 = vld [vmem:[#allocation17_spill] sm:$0xff] }
 0x13b   : > { %1316 = vmatprep.subr.mxu0 %v1303_v51  ;;  %v1133_v33 = vadd.f32 %v2956_v5, %v2952_v29  ;;  %v1292_v6 = vmul.f32 %v1143_v11, %v622_v9  ;;  %v1273_v42 = vadd.s32 32, %v1271_v58  ;;  %v612_v44 = vadd.f32 %v2957_v41, %v2954_v10  ;;  %v2963_v51 = vld [vmem:[#allocation16_spill] sm:$0xff] }
 0x13c   : > { %1317 = vmatpush1.msra.mxu0 %v1302_v0  ;;  %v1291_v45 = vmul.f32 %v1141_v16, %v618_v15  ;;  %v1290_v27 = vmul.f32 %v1139_v26, %v616_v25  ;;  %vm1272_vm1 = vcmp.ge.s32.totalorder %v2654_v8, %v1271_v58  ;;  %v2962_v40 = vmov 0.0  }
 0x13d   : > { %1318 = vmatprep.subr.mxu0 %v1301_v61  ;;  %v1289_v63 = vmul.f32 %v1135_v35, %v612_v44  ;;  %v1288_v43 = vmul.f32 %v1133_v33, %v610_v39  ;;  %vm1274_vm2 = vcmp.lt.s32.totalorder %v2654_v8, %v1273_v42  ;;  %v2968_v61 = vld [vmem:[#allocation7_spill] sm:$0xff]  ;;  %v2681_v10 = vmul.u32 32, %v2654_v8 }
 0x13e   : > { %1319 = vmatpush1.msra.mxu0 %v1300_v23  ;;  %vm1275_vm3 = vmand %vm1272_vm1, %vm1274_vm2  ;;  %v1420_v39 = vadd.s32 8, %v2621_v52  ;;  %v1421_v8 = vadd.s32 16, %v2621_v52  ;;  %v1422_v44 = vadd.s32 24, %v2621_v52 }
 0x13f   : > { %1320 = vmatprep.subr.mxu0 %v1299_v13  ;;  %v1276_v47 = vsel %vm1275_vm3, 1.0, %v2962_v40  ;;  %v2684_v36 = vadd.s32 32, %v2681_v10  ;;  %vm1436_vm5 = vcmp.ge.s32.totalorder %v2621_v52, %v2681_v10 }
 0x140   : > { %1321 = vmatpush1.msra.mxu0 %v1298_v17  ;;  %v1277_v0 = vsub.f32 0.5, %v1276_v47  ;;  %vm1437_vm8 = vcmp.ge.s32.totalorder %v1420_v39, %v2681_v10  ;;  %vm1438_vm12 = vcmp.ge.s32.totalorder %v1421_v8, %v2681_v10  ;;  %vm1439_vm15 = vcmp.ge.s32.totalorder %v1422_v44, %v2681_v10 }
 0x141   : > { %1322 = vmatprep.subr.mxu0 %v1297_v46  ;;  %vm1453_vm6 = vcmp.lt.s32.totalorder %v2621_v52, %v2684_v36  ;;  %vm1454_vm9 = vcmp.lt.s32.totalorder %v1420_v39, %v2684_v36  ;;  %vm1455_vm13 = vcmp.lt.s32.totalorder %v1421_v8, %v2684_v36  ;;  %vm1456_vm0 = vcmp.lt.s32.totalorder %v1422_v44, %v2684_v36 }
 0x142   : > { %1323 = vmatpush1.msra.mxu0 %v1296_v56  ;;  %vm1469_vm7 = vmand %vm1436_vm5, %vm1453_vm6 }
 0x143   : > { %1324 = vmatprep.subr.mxu0 %v1295_v3  ;;  %v1485_v41 = vsel %vm1469_vm7, 1.0, %v2962_v40  ;;  %vm1470_vm11 = vmand %vm1437_vm8, %vm1454_vm9 }
 0x144   : > { %1325 = vmatpush1.msra.mxu0 %v1294_v14  ;;  %vm1471_vm14 = vmand %vm1438_vm12, %vm1455_vm13 }
 0x145   : > { %1326 = vmatprep.subr.mxu0 %v1293_v59  ;;  %vm1472_vm1 = vmand %vm1439_vm15, %vm1456_vm0 }
 0x146   : > { %1327 = vmatpush1.msra.mxu0 %v1292_v6 }
 0x147   : > { %1328 = vmatprep.subr.mxu0 %v1291_v45  ;;  %v1486_v45 = vsel %vm1470_vm11, 1.0, %v2962_v40 }
 0x148   : > { %1329 = vmatpush1.msra.mxu0 %v1290_v27  ;;  %v1423_v27 = vadd.s32 32, %v2621_v52 }
 0x149   : > { %1330 = vmatprep.subr.mxu0 %v1289_v63  ;;  %v1487_v63 = vsel %vm1471_vm14, 1.0, %v2962_v40 }
 0x14a   : > { %1331 = vmatpush1.msra.mxu0 %v1288_v43  ;;  %vm1440_vm2 = vcmp.ge.s32.totalorder %v1423_v27, %v2681_v10  ;;  %vm1457_vm3 = vcmp.lt.s32.totalorder %v1423_v27, %v2684_v36  ;;  %v1424_v43 = vadd.s32 40, %v2621_v52 }
 0x14b   : > { %1332 = vmatprep.subr.mxu0 %v2958_v48  ;;  %v1488_v48 = vsel %vm1472_vm1, 1.0, %v2962_v40 }
 0x14c   : > { %1333 = vmatpush1.msra.mxu0 %v2959_v2  ;;  %vm1441_vm5 = vcmp.ge.s32.totalorder %v1424_v43, %v2681_v10  ;;  %vm1458_vm6 = vcmp.lt.s32.totalorder %v1424_v43, %v2684_v36  ;;  %v1425_v2 = vadd.s32 48, %v2621_v52 }
 0x14d   : > { %1334 = vmatprep.subr.mxu0 %v2960_v34  ;;  %vm1474_vm7 = vmand %vm1441_vm5, %vm1458_vm6 }
 0x14e   : > { %1335 = vmatpush1.msra.mxu0 %v2961_v37  ;;  %vm1442_vm8 = vcmp.ge.s32.totalorder %v1425_v2, %v2681_v10  ;;  %vm1459_vm9 = vcmp.lt.s32.totalorder %v1425_v2, %v2684_v36  ;;  %v1426_v37 = vadd.s32 56, %v2621_v52  ;;  %v1490_v47 = vsel %vm1474_vm7, 1.0, %v2962_v40 }
 0x14f   : > { %1336 = vmatprep.subr.mxu0 %v2963_v51  ;;  %vm1475_vm11 = vmand %vm1442_vm8, %vm1459_vm9  ;;  %v1427_v51 = vadd.s32 64, %v2621_v52 }
 0x150   : > { %1337 = vmatpush1.msra.mxu0 %v2964_v62  ;;  %vm1443_vm12 = vcmp.ge.s32.totalorder %v1426_v37, %v2681_v10  ;;  %vm1460_vm13 = vcmp.lt.s32.totalorder %v1426_v37, %v2684_v36  ;;  %v1491_v62 = vsel %vm1475_vm11, 1.0, %v2962_v40 }
 0x151   : > { %1338 = vmatprep.subr.mxu0 %v2965_v30  ;;  %vm1476_vm14 = vmand %vm1443_vm12, %vm1460_vm13  ;;  %vm1444_vm15 = vcmp.ge.s32.totalorder %v1427_v51, %v2681_v10  ;;  %vm1461_vm0 = vcmp.lt.s32.totalorder %v1427_v51, %v2684_v36  ;;  %v1428_v30 = vadd.s32 72, %v2621_v52 }
 0x152   : > { %1339 = vmatpush1.msra.mxu0 %v2966_v50  ;;  %vm1477_vm1 = vmand %vm1444_vm15, %vm1461_vm0  ;;  %v1429_v50 = vadd.s32 80, %v2621_v52 }
 0x153   : > { %1340 = vmatprep.subr.mxu0 %v2967_v53  ;;  %v1493_v53 = vsel %vm1477_vm1, 1.0, %v2962_v40 }
 0x154   : > { %1341 = vmatpush1.msra.mxu0 %v2968_v61  ;;  %vm1446_vm5 = vcmp.ge.s32.totalorder %v1429_v50, %v2681_v10  ;;  %vm1463_vm6 = vcmp.lt.s32.totalorder %v1429_v50, %v2684_v36  ;;  %v1430_v61 = vadd.s32 88, %v2621_v52 }
 0x155   : > { %1375 = vmatmul.mubr.f32.vlgmr.msra.gmra.mxu0 %v1277_v0  ;;  %v1492_v0 = vsel %vm1476_vm14, 1.0, %v2962_v40  ;;  %vm1479_vm7 = vmand %vm1446_vm5, %vm1463_vm6 }
 0x156   : > { %1620 = vmatprep.mubr.f32.mxu0 %v2962_v40  ;;  %vm1447_vm8 = vcmp.ge.s32.totalorder %v1430_v61, %v2681_v10  ;;  %vm1464_vm9 = vcmp.lt.s32.totalorder %v1430_v61, %v2684_v36 }
 0x157   : > { %vm1480_vm11 = vmand %vm1447_vm8, %vm1464_vm9 }
 0x215   : > { %v1376_v49 = vpop.f32.mrf.mxu0 }
 0x216   : > { %v1382_v7 = vsel %vm1381_vm4, %v1376_v49, -inf }
 0x217   : > { %v1383_v23 = vrot.slane %v1382_v7, 4  ;;  %v1378_v55 = vpop.f32.mrf.mxu0 }
 0x218   : > { %v1389_v12 = vsel %vm1381_vm4, %v1378_v55, -inf }
 0x219   : > { %v1384_v13 = vmax.f32 %v1382_v7, %v1383_v23  ;;  %v1390_v32 = vrot.slane %v1389_v12, 4  ;;  %v1431_v7 = vadd.s32 96, %v2621_v52  ;;  %v1495_v23 = vsel %vm1479_vm7, 1.0, %v2962_v40 }
 0x21b   : > { %v1385_v54 = vrot.slane %v1384_v13, 2  ;;  %v1391_v1 = vmax.f32 %v1389_v12, %v1390_v32  ;;  %vm1448_vm12 = vcmp.ge.s32.totalorder %v1431_v7, %v2681_v10  ;;  %vm1465_vm13 = vcmp.lt.s32.totalorder %v1431_v7, %v2684_v36 }
 0x21c   : > { %v1496_v12 = vsel %vm1480_vm11, 1.0, %v2962_v40  ;;  %vm1481_vm14 = vmand %vm1448_vm12, %vm1465_vm13 }
 0x21d   : > { %v1386_v17 = vmax.f32 %v1384_v13, %v1385_v54  ;;  %v1392_v19 = vrot.slane %v1391_v1, 2  ;;  %v1433_v13 = vadd.s32 112, %v2621_v52  ;;  %v1497_v32 = vsel %vm1481_vm14, 1.0, %v2962_v40 }
 0x21e   : > { %v1434_v54 = vadd.s32 120, %v2621_v52 }
 0x21f   : > { %v1387_v21 = vrot.slane %v1386_v17, 1  ;;  %v1393_v46 = vmax.f32 %v1391_v1, %v1392_v19  ;;  %v1188_v19 = vpop.f32.mrf.mxu1 }
 0x220   : > { %vm1451_vm5 = vcmp.ge.s32.totalorder %v1434_v54, %v2681_v10  ;;  %vm1468_vm6 = vcmp.lt.s32.totalorder %v1434_v54, %v2684_v36 }
 0x221   : > { %v1388_v9 = vmax.f32 %v1386_v17, %v1387_v21  ;;  %v1394_v28 = vrot.slane %v1393_v46, 1  ;;  %vm1484_vm7 = vmand %vm1451_vm5, %vm1468_vm6  ;;  %v1190_v21 = vpop.f32.mrf.mxu1 }
 0x223   : > { %v1396_v11 = vsub.f32 %v1376_v49, %v1388_v9  ;;  %v1395_v56 = vmax.f32 %v1393_v46, %v1394_v28  ;;  %v1192_v46 = vpop.f32.mrf.mxu1 }
 0x225   : > { %v1398_v58 = vmul.f32 1.442695, %v1396_v11  ;;  %v1397_v38 = vsub.f32 %v1378_v55, %v1395_v56  ;;  %v1432_v55 = vadd.s32 104, %v2621_v52  ;;  %v1500_v52 = vsel %vm1484_vm7, 1.0, %v2962_v40  ;;  %v1194_v9 = vpop.f32.mrf.mxu1 }
 0x227   : > { %2052 = vpow2.f32 %v1398_v58  ;;  %v1400_v20 = vmul.f32 1.442695, %v1397_v38  ;;  %vm1449_vm15 = vcmp.ge.s32.totalorder %v1432_v55, %v2681_v10  ;;  %vm1466_vm0 = vcmp.lt.s32.totalorder %v1432_v55, %v2684_v36  ;;  %v1198_v28 = vpop.f32.mrf.mxu1 }
 0x228   : > { %vm1482_vm1 = vmand %vm1449_vm15, %vm1466_vm0 }
 0x229   : > { %2054 = vpow2.f32 %v1400_v20  ;;  %v1498_v1 = vsel %vm1482_vm1, 1.0, %v2962_v40  ;;  %v1200_v11 = vpop.f32.mrf.mxu1 }
 0x22b   : > { %v1202_v56 = vpop.f32.mrf.mxu1 }
 0x22d   : > { %v1204_v58 = vpop.f32.mrf.mxu1 }
 0x22f   : > { %v1208_v38 = vpop.f32.mrf.mxu1 }
 0x231   : > { %v1210_v20 = vpop.f32.mrf.mxu1 }
 0x234   : > { %v2053_v22 = vpop.eup %2052 }
 0x235   : > { %v1402_v57 = vsel %vm1381_vm4, %v2053_v22, 0.0 }
 0x236   : > { %v2055_v16 = vpop.eup %2054  ;;  %v1403_v3 = vrot.slane %v1402_v57, 4 }
 0x237   : > { %v1409_v24 = vsel %vm1381_vm4, %v2055_v16, 0.0 }
 0x238   : > { %v1404_v4 = vadd.f32 %v1403_v3, %v1402_v57  ;;  %v1410_v25 = vrot.slane %v1409_v24, 4 }
 0x23a   : > { %v1405_v18 = vrot.slane %v1404_v4, 2  ;;  %v1411_v26 = vadd.f32 %v1410_v25, %v1409_v24 }
 0x23c   : > { %v1406_v14 = vadd.f32 %v1405_v18, %v1404_v4  ;;  %v1412_v60 = vrot.slane %v1411_v26, 2 }
 0x23e   : > { %v1407_v15 = vrot.slane %v1406_v14, 1  ;;  %v1413_v29 = vadd.f32 %v1412_v60, %v1411_v26 }
 0x240   : > { %v1408_v31 = vadd.f32 %v1407_v15, %v1406_v14  ;;  %v1414_v35 = vrot.slane %v1413_v29, 1  ;;  %v821_v15 = vpop.permute.xlu0 %820 }
 0x241   : > { %v1189_v54 = vadd.f32 %v1188_v19, %v821_v15 }
 0x242   : > { %v1415_v59 = vadd.f32 %v1414_v35, %v1413_v29  ;;  %2056 = vrcp.f32 %v1408_v31  ;;  %v826_v31 = vpop.permute.xlu1 %825 }
 0x244   : > { %2058 = vrcp.f32 %v1415_v59 }
 0x24f   : > { %v2057_v5 = vpop.eup %2056 }
 0x250   : > { %v1418_v42 = vmul.f32 %v2057_v5, %v2053_v22  ;;  %v2784_v22 = vpop.f32.mrf.mxu1 }
 0x251   : > { %v2059_v33 = vpop.eup %2058 }
 0x252   : > { %v1419_v6 = vmul.f32 %v2059_v33, %v2055_v16  ;;  %v2786_v57 = vpop.f32.mrf.mxu1  ;;  %v836_v33 = vpop.permute.xlu1 %835 }
 0x254   : > { %1961 = vmatprep.subr.msk.mxu0 %vm1381_vm4, %v1419_v6  ;;  %v2788_v16 = vpop.f32.mrf.mxu1 }
 0x255   : > { %1962 = vmatpush1.msk.msra.mxu0 %vm1381_vm4, %v1418_v42  ;;  %vm1473_vm4 = vmand %vm1440_vm2, %vm1457_vm3  ;;  %vm1445_vm2 = vcmp.ge.s32.totalorder %v1428_v30, %v2681_v10  ;;  %vm1462_vm3 = vcmp.lt.s32.totalorder %v1428_v30, %v2684_v36 }
 0x256   : > { %1963 = vmatmul.mubr.msk.f32.vlgmr.msra.gmra.mxu0 %vm1501_vm10, %v1485_v41  ;;  %v1489_v34 = vsel %vm1473_vm4, 1.0, %v2962_v40  ;;  %vm1478_vm4 = vmand %vm1445_vm2, %vm1462_vm3  ;;  %vm1450_vm2 = vcmp.ge.s32.totalorder %v1433_v13, %v2681_v10  ;;  %vm1467_vm3 = vcmp.lt.s32.totalorder %v1433_v13, %v2684_v36  ;;  %v2790_v3 = vpop.f32.mrf.mxu1  ;;  %v831_v36 = vpop.permute.xlu0 %830 }
 0x257   : > { %1626 = vmatprep.mubr.f32.mxu0 %v2962_v40  ;;  %v1494_v49 = vsel %vm1478_vm4, 1.0, %v2962_v40  ;;  %vm1483_vm4 = vmand %vm1450_vm2, %vm1467_vm3 }
 0x258   : > { %v1499_v17 = vsel %vm1483_vm4, 1.0, %v2962_v40 }
 0x25a   : > { %1964 = vmatmul.mubr.msk.f32.gmra.mxu0 %vm1501_vm10, %v1486_v45  ;;  %v841_v41 = vpop.permute.xlu0 %840  ;;  %v846_v45 = vpop.permute.xlu1 %845 }
 0x25b   : > { %1632 = vmatprep.mubr.f32.mxu0 %v2962_v40 }
 0x25e   : > { %1965 = vmatmul.mubr.msk.f32.gmra.mxu0 %vm1501_vm10, %v1487_v63  ;;  %v856_v37 = vpop.permute.xlu1 %855 }
 0x25f   : > { %1638 = vmatprep.mubr.f32.mxu0 %v2962_v40 }
 0x262   : > { %1966 = vmatmul.mubr.msk.f32.gmra.mxu0 %vm1501_vm10, %v1488_v48  ;;  %v851_v48 = vpop.permute.xlu0 %850  ;;  %v866_v50 = vpop.permute.xlu1 %865 }
 0x263   : > { %1644 = vmatprep.mubr.f32.mxu0 %v2962_v40  ;;  %v1219_v19 = vadd.f32 %v2788_v16, %v851_v48 }
 0x266   : > { %1967 = vmatmul.mubr.msk.f32.gmra.mxu0 %vm1501_vm10, %v1489_v34  ;;  %v861_v30 = vpop.permute.xlu0 %860 }
 0x267   : > { %1650 = vmatprep.mubr.f32.mxu0 %v2962_v40 }
 0x26a   : > { %1968 = vmatmul.mubr.msk.f32.gmra.mxu0 %vm1501_vm10, %v1490_v47  ;;  %v871_v7 = vpop.permute.xlu0 %870 }
 0x26b   : > { %1656 = vmatprep.mubr.f32.mxu0 %v2962_v40 }
 0x26e   : > { %1969 = vmatmul.mubr.msk.f32.gmra.mxu0 %vm1501_vm10, %v1491_v62 }
 0x26f   : > { %1662 = vmatprep.mubr.f32.mxu0 %v2962_v40 }
 0x272   : > { %1970 = vmatmul.mubr.msk.f32.gmra.mxu0 %vm1501_vm10, %v1492_v0 }
 0x273   : > { %1668 = vmatprep.mubr.f32.mxu0 %v2962_v40 }
 0x276   : > { %1971 = vmatmul.mubr.msk.f32.gmra.mxu0 %vm1501_vm10, %v1493_v53 }
 0x277   : > { %1674 = vmatprep.mubr.f32.mxu0 %v2962_v40 }
 0x27a   : > { %1972 = vmatmul.mubr.msk.f32.gmra.mxu0 %vm1501_vm10, %v1494_v49 }
 0x27b   : > { %1680 = vmatprep.mubr.f32.mxu0 %v2962_v40 }
 0x27e   : > { %1973 = vmatmul.mubr.msk.f32.gmra.mxu0 %vm1501_vm10, %v1495_v23 }
 0x27f   : > { %1686 = vmatprep.mubr.f32.mxu0 %v2962_v40 }
 0x282   : > { %1974 = vmatmul.mubr.msk.f32.gmra.mxu0 %vm1501_vm10, %v1496_v12  ;;  %v876_v12 = vpop.permute.xlu1 %875 }
 0x283   : > { %1692 = vmatprep.mubr.f32.mxu0 %v2962_v40 }
 0x286   : > { %1975 = vmatmul.mubr.msk.f32.gmra.mxu0 %vm1501_vm10, %v1497_v32 }
 0x287   : > { %1698 = vmatprep.mubr.f32.mxu0 %v2962_v40 }
 0x28a   : > { %1976 = vmatmul.mubr.msk.f32.gmra.mxu0 %vm1501_vm10, %v1498_v1  ;;  %v1191_v1 = vadd.f32 %v1190_v21, %v821_v15  ;;  %v1221_v21 = vadd.f32 %v2790_v3, %v851_v48 }
 0x28b   : > { %1704 = vmatprep.mubr.f32.mxu0 %v2962_v40 }
 0x28e   : > { %1977 = vmatmul.mubr.msk.f32.gmra.mxu0 %vm1501_vm10, %v1499_v17 }
 0x28f   : > { %1710 = vmatprep.mubr.f32.mxu0 %v2962_v40  ;;  %v2792_v40 = vpop.f32.mrf.mxu1 }
 0x291   : > { %v2794_v24 = vpop.f32.mrf.mxu1 }
 0x292   : > { %1978 = vmatmul.mubr.msk.f32.gmra.mxu0 %vm1501_vm10, %v1500_v52  ;;  %v881_v52 = vpop.permute.xlu0 %880 }
 0x293   : > { %v2796_v4 = vpop.f32.mrf.mxu1 }
 0x295   : > { %v2798_v25 = vpop.f32.mrf.mxu1 }
 0x297   : > { %v2800_v18 = vpop.f32.mrf.mxu1 }
 0x299   : > { %v2804_v14 = vpop.f32.mrf.mxu1 }
 0x29b   : > { %v1238_v35 = vpop.f32.mrf.mxu1 }
 0x29d   : > { %v1240_v39 = vpop.f32.mrf.mxu1 }
 0x29f   : > { %v1242_v6 = vpop.f32.mrf.mxu1 }
 0x2a0   : > { %v1243_v16 = vadd.f32 %v1242_v6, %v876_v12 }
 0x2a1   : > { %v1244_v27 = vpop.f32.mrf.mxu1 }
 0x2a2   : > { %v2846_v3 = vadd.f32 %v1244_v27, %v876_v12 }
 0x2a3   : > { %v1248_v2 = vpop.f32.mrf.mxu1 }
 0x2a5   : > { %v1250_v51 = vpop.f32.mrf.mxu1 }
 0x2a7   : > { %v1252_v53 = vpop.f32.mrf.mxu1 }
 0x2a9   : > { %v1254_v23 = vpop.f32.mrf.mxu1 }
 0x2ab   : > { %v1258_v32 = vpop.f32.mrf.mxu1 }
 0x2ad   : > { %v1260_v15 = vpop.f32.mrf.mxu1 }
 0x316   : > { %v2802_v26 = vpop.f32.mrf.mxu0 }
 0x318   : > { %v2806_v60 = vpop.f32.mrf.mxu0 }
 0x31a   : > { %v2808_v29 = vpop.f32.mrf.mxu0 }
 0x31b   : > { %2969 = vst [vmem:[#allocation25_spill] sm:$0xff] %v2808_v29  ;;  %v1213_v29 = vadd.f32 %v2784_v22, %v846_v45 }
 0x31c   : > { %v2810_v59 = vpop.f32.mrf.mxu0 }
 0x31d   : > { %2970 = vst [vmem:[#allocation15_spill] sm:$0xff] %v2810_v59  ;;  %v886_v59 = vpop.permute.xlu1 %885 }
 0x31e   : > { %v2812_v10 = vpop.f32.mrf.mxu0  ;;  %v1255_v48 = vadd.f32 %v1254_v23, %v886_v59 }
 0x31f   : > { %2971 = vst [vmem:[#allocation3_spill] sm:$0xff] %v2812_v10  ;;  %v1209_v10 = vadd.f32 %v1208_v38, %v841_v41  ;;  %v1235_v38 = vadd.f32 %v2804_v14, %v866_v50 }
 0x320   : > { %v2814_v5 = vpop.f32.mrf.mxu0 }
 0x321   : > { %2972 = vst [vmem:[#allocation24_spill] sm:$0xff] %v2814_v5  ;;  %v2832_v5 = vadd.f32 %v1204_v58, %v836_v33  ;;  %v1233_v58 = vadd.f32 %v2800_v18, %v866_v50 }
 0x322   : > { %v2816_v8 = vpop.f32.mrf.mxu0 }
 0x323   : > { %2973 = vst [vmem:[#allocation2_spill] sm:$0xff] %v2816_v8  ;;  %v1199_v8 = vadd.f32 %v1198_v28, %v831_v36  ;;  %v1229_v28 = vadd.f32 %v2796_v4, %v861_v30  ;;  %v1717_v4 = vmul.f32 %v2802_v26, %v1189_v54  ;;  %v2982_v26 = vld [vmem:[#allocation25_spill] sm:$0xff] }
 0x324   : > { %v2818_v42 = vpop.f32.mrf.mxu0 }
 0x325   : > { %2974 = vst [vmem:[#allocation10_spill] sm:$0xff] %v2818_v42  ;;  %v1193_v42 = vadd.f32 %v1192_v46, %v826_v31  ;;  %v1223_v46 = vadd.f32 %v2792_v40, %v856_v37 }
 0x326   : > { %v1646_v44 = vpop.f32.mrf.mxu0  ;;  %v2985_v12 = vld [vmem:[#allocation3_spill] sm:$0xff] }
 0x327   : > { %v1725_v22 = vmul.f32 %v1646_v44, %v1209_v10  ;;  %v1718_v10 = vmul.f32 %v2806_v60, %v1191_v1  ;;  %v1721_v60 = vmul.f32 %v2985_v12, %v1199_v8 }
 0x328   : > { %v1648_v63 = vpop.f32.mrf.mxu0 }
 0x32a   : > { %v2820_v43 = vpop.f32.mrf.mxu0 }
 0x32b   : > { %2975 = vst [vmem:[#allocation23_spill] sm:$0xff] %v2820_v43  ;;  %v1215_v43 = vadd.f32 %v2786_v57, %v846_v45  ;;  %v1241_v57 = vadd.f32 %v1240_v39, %v871_v7  ;;  %v1253_v45 = vadd.f32 %v1252_v53, %v886_v59  ;;  %v1749_v39 = vadd.f32 %v1725_v22, %v1717_v4 }
 0x32c   : > { %v2822_v34 = vpop.f32.mrf.mxu0 }
 0x32d   : > { %2976 = vst [vmem:[#allocation12_spill] sm:$0xff] %v2822_v34 }
 0x32e   : > { %v2824_v47 = vpop.f32.mrf.mxu0 }
 0x32f   : > { %2977 = vst [vmem:[#allocation5_spill] sm:$0xff] %v2824_v47  ;;  %v1201_v47 = vadd.f32 %v1200_v11, %v831_v36  ;;  %v1231_v11 = vadd.f32 %v2798_v25, %v861_v30  ;;  %v891_v36 = vpop.permute.xlu0 %890 }
 0x330   : > { %v2826_v62 = vpop.f32.mrf.mxu0  ;;  %v1259_v18 = vadd.f32 %v1258_v32, %v891_v36  ;;  %v2986_v32 = vld [vmem:[#allocation24_spill] sm:$0xff] }
 0x331   : > { %2978 = vst [vmem:[#allocation22_spill] sm:$0xff] %v2826_v62  ;;  %v1195_v62 = vadd.f32 %v1194_v9, %v826_v31  ;;  %v2840_v9 = vadd.f32 %v2794_v24, %v856_v37  ;;  %v1249_v31 = vadd.f32 %v1248_v2, %v881_v52  ;;  %v1251_v24 = vadd.f32 %v1250_v51, %v881_v52  ;;  %v2983_v51 = vld [vmem:[#allocation15_spill] sm:$0xff] }
 0x332   : > { %v2828_v0 = vpop.f32.mrf.mxu0  ;;  %v2849_v37 = vadd.f32 %v1260_v15, %v891_v36  ;;  %v2981_v6 = vld [vmem:[#allocation23_spill] sm:$0xff] }
 0x333   : > { %2979 = vst [vmem:[#allocation4_spill] sm:$0xff] %v2828_v0  ;;  %v1203_v0 = vadd.f32 %v1202_v56, %v836_v33  ;;  %v1262_v33 = vpop.f32.mrf.mxu1  ;;  %v1727_v44 = vmul.f32 %v2981_v6, %v1213_v29  ;;  %v1720_v30 = vmul.f32 %v2983_v51, %v1195_v62  ;;  %v1722_v29 = vmul.f32 %v2986_v32, %v1201_v47 }
 0x334   : > { %v2830_v61 = vpop.f32.mrf.mxu0  ;;  %v2984_v59 = vld [vmem:[#allocation12_spill] sm:$0xff] }
 0x335   : > { %2980 = vst [vmem:[#allocation6_spill] sm:$0xff] %v2830_v61  ;;  %v1211_v61 = vadd.f32 %v1210_v20, %v841_v41  ;;  %v1239_v20 = vadd.f32 %v1238_v35, %v871_v7  ;;  %v2851_v35 = vpop.permute.xlu1 %895  ;;  %v1728_v50 = vmul.f32 %v2984_v59, %v1215_v43  ;;  %v2988_v43 = vld [vmem:[#allocation2_spill] sm:$0xff]  ;;  %v1264_v51 = vpop.f32.mrf.mxu1 }
 0x336   : > { %v1670_v49 = vpop.f32.mrf.mxu0  ;;  %v2856_v2 = vadd.f32 %v1262_v33, %v2851_v35  ;;  %v2060_v33 = vld [vmem:[%s2181_s16] sm:$0xff] }
 0x337   : > { %v1726_v41 = vmul.f32 %v1648_v63, %v1211_v61  ;;  %v1733_v25 = vmul.f32 %v1670_v49, %v1229_v28  ;;  %v1719_v63 = vmul.f32 %v2982_v26, %v1193_v42  ;;  %v1752_v22 = vadd.f32 %v1728_v50, %v1720_v30  ;;  %v2062_v30 = vld [vmem:[%s2181_s16 + $0x10] sm:$0xff]  ;;  %v2992_v50 = vld [vmem:[#allocation10_spill] sm:$0xff] }
 0x338   : > { %v1672_v55 = vpop.f32.mrf.mxu0  ;;  %v2989_v36 = vld [vmem:[#allocation22_spill] sm:$0xff] }
 0x339   : > { %v1734_v27 = vmul.f32 %v1672_v55, %v1231_v11  ;;  %v1750_v61 = vadd.f32 %v1726_v41, %v1718_v10  ;;  %v1757_v49 = vadd.f32 %v1749_v39, %v1733_v25  ;;  %v2987_v55 = vld [vmem:[#allocation5_spill] sm:$0xff]  ;;  %v1751_v42 = vadd.f32 %v1727_v44, %v1719_v63  ;;  %v2061_v41 = vld [vmem:[%s2181_s16 + $0x8] sm:$0xff] }
 0x33a   : > { %v1676_v13 = vpop.f32.mrf.mxu0  ;;  %v1729_v54 = vmul.f32 %v2987_v55, %v1219_v19  ;;  %v1723_v11 = vmul.f32 %v2988_v43, %v1203_v0  ;;  %v2066_v43 = vld [vmem:[%s2181_s16 + $0x30] sm:$0xff] }
 0x33b   : > { %v1735_v7 = vmul.f32 %v1676_v13, %v1233_v58  ;;  %v1758_v15 = vadd.f32 %v1750_v61, %v1734_v27  ;;  %v1730_v13 = vmul.f32 %v2989_v36, %v1221_v21 }
 0x33c   : > { %v1678_v17 = vpop.f32.mrf.mxu0  ;;  %v2991_v6 = vld [vmem:[#allocation6_spill] sm:$0xff] }
 0x33d   : > { %v1736_v1 = vmul.f32 %v1678_v17, %v1235_v38  ;;  %v1759_v8 = vadd.f32 %v1751_v42, %v1735_v7  ;;  %v1753_v17 = vadd.f32 %v1729_v54, %v1721_v60  ;;  %v2990_v38 = vld [vmem:[#allocation4_spill] sm:$0xff]  ;;  %v1732_v44 = vmul.f32 %v2991_v6, %v2840_v9 }
 0x33e   : > { %v1682_v34 = vpop.f32.mrf.mxu0  ;;  %v1731_v0 = vmul.f32 %v2990_v38, %v1223_v46 }
 0x33f   : > { %v1737_v58 = vmul.f32 %v1682_v34, %v1239_v20 }
 0x340   : > { %v1684_v56 = vpop.f32.mrf.mxu0 }
 0x341   : > { %v1738_v21 = vmul.f32 %v1684_v56, %v1241_v57  ;;  %v1761_v27 = vadd.f32 %v1753_v17, %v1737_v58 }
 0x342   : > { %v1688_v40 = vpop.f32.mrf.mxu0 }
 0x343   : > { %v1739_v26 = vmul.f32 %v1688_v40, %v1243_v16  ;;  %v2063_v40 = vld [vmem:[%s2181_s16 + $0x18] sm:$0xff] }
 0x344   : > { %v1690_v14 = vpop.f32.mrf.mxu0 }
 0x345   : > { %v1740_v9 = vmul.f32 %v1690_v14, %v2846_v3  ;;  %v2064_v3 = vld [vmem:[%s2181_s16 + $0x20] sm:$0xff] }
 0x346   : > { %v1694_v53 = vpop.f32.mrf.mxu0 }
 0x347   : > { %v1741_v23 = vmul.f32 %v1694_v53, %v1249_v31  ;;  %v1755_v53 = vadd.f32 %v1731_v0, %v1723_v11 }
 0x348   : > { %v1696_v52 = vpop.f32.mrf.mxu0 }
 0x349   : > { %v1765_v62 = vadd.f32 %v1757_v49, %v1741_v23  ;;  %v1742_v28 = vmul.f32 %v1696_v52, %v1251_v24  ;;  %v1760_v24 = vadd.f32 %v1752_v22, %v1736_v1  ;;  %v1763_v32 = vadd.f32 %v1755_v53, %v1739_v26 }
 0x34a   : > { %v1700_v31 = vpop.f32.mrf.mxu0 }
 0x34b   : > { %v1773_v47 = vadd.f32 %v2060_v33, %v1765_v62  ;;  %v1766_v4 = vadd.f32 %v1758_v15, %v1742_v28  ;;  %v1743_v19 = vmul.f32 %v1700_v31, %v1253_v45  ;;  %v1754_v45 = vadd.f32 %v1730_v13, %v1722_v29  ;;  %v2067_v13 = vld [vmem:[%s2181_s16 + $0x38] sm:$0xff] }
 0x34c   : > { %v1702_v34 = vpop.f32.mrf.mxu0 }
 0x34d   : > { %v1781_v20 = vmul.f32 0.5, %v1773_v47  ;;  %v1774_v25 = vadd.f32 %v2061_v41, %v1766_v4  ;;  %v1767_v10 = vadd.f32 %v1759_v8, %v1743_v19  ;;  %v1744_v39 = vmul.f32 %v1702_v34, %v1255_v48 }
 0x34e   : > { %v1706_v63 = vpop.f32.mrf.mxu0  ;;  %v1724_v48 = vmul.f32 %v2992_v50, %v2832_v5  ;;  %v1762_v61 = vadd.f32 %v1754_v45, %v1738_v21 }
 0x34f   : > { %1789 = vst [vmem:[%s2872_s8] sm:$0xff] %v1781_v20  ;;  %v1782_v46 = vmul.f32 0.5, %v1774_v25  ;;  %v1775_v56 = vadd.f32 %v2062_v30, %v1767_v10  ;;  %v1768_v57 = vadd.f32 %v1760_v24, %v1744_v39  ;;  %v1745_v59 = vmul.f32 %v1706_v63, %v1259_v18 }
 0x350   : > { %v1708_v49 = vpop.f32.mrf.mxu0  ;;  %v1265_v18 = vadd.f32 %v1264_v51, %v2851_v35  ;;  %v1756_v60 = vadd.f32 %v1732_v44, %v1724_v48  ;;  %v2065_v35 = vld [vmem:[%s2181_s16 + $0x28] sm:$0xff] }
 0x351   : > { %1790 = vst [vmem:[%s2872_s8 + $0x8] sm:$0xff] %v1782_v46  ;;  %v1783_v16 = vmul.f32 0.5, %v1775_v56  ;;  %v1776_v7 = vadd.f32 %v2063_v40, %v1768_v57  ;;  %v1769_v23 = vadd.f32 %v1761_v27, %v1745_v59  ;;  %v1746_v12 = vmul.f32 %v1708_v49, %v2849_v37 }
 0x352   : > { %v1712_v5 = vpop.f32.mrf.mxu0  ;;  %v1764_v1 = vadd.f32 %v1756_v60, %v1740_v9 }
 0x353   : > { %1791 = vst [vmem:[%s2872_s8 + $0x10] sm:$0xff] %v1783_v16  ;;  %v1784_v29 = vmul.f32 0.5, %v1776_v7  ;;  %v1777_v14 = vadd.f32 %v2064_v3, %v1769_v23  ;;  %v1770_v55 = vadd.f32 %v1762_v61, %v1746_v12  ;;  %v1747_v54 = vmul.f32 %v1712_v5, %v2856_v2 }
 0x354   : > { %v1714_v52 = vpop.f32.mrf.mxu0 }
 0x355   : > { %1792 = vst [vmem:[%s2872_s8 + $0x18] sm:$0xff] %v1784_v29  ;;  %v1785_v37 = vmul.f32 0.5, %v1777_v14  ;;  %v1778_v42 = vadd.f32 %v2065_v35, %v1770_v55  ;;  %v1771_v15 = vadd.f32 %v1763_v32, %v1747_v54  ;;  %v1748_v62 = vmul.f32 %v1714_v52, %v1265_v18 }
 0x357   : > { %1793 = vst [vmem:[%s2872_s8 + $0x20] sm:$0xff] %v1785_v37  ;;  %v1786_v28 = vmul.f32 0.5, %v1778_v42  ;;  %v1779_v11 = vadd.f32 %v2066_v43, %v1771_v15  ;;  %v1772_v22 = vadd.f32 %v1764_v1, %v1748_v62 }
 0x359   : > { %1794 = vst [vmem:[%s2872_s8 + $0x28] sm:$0xff] %v1786_v28  ;;  %v1787_v36 = vmul.f32 0.5, %v1779_v11  ;;  %v1780_v2 = vadd.f32 %v2067_v13, %v1772_v22 }
 0x35b   : > { %1795 = vst [vmem:[%s2872_s8 + $0x30] sm:$0xff] %v1787_v36  ;;  %v1788_v58 = vmul.f32 0.5, %v1780_v2 }
 0x35d   : > { %1796 = vst [vmem:[%s2872_s8 + $0x38] sm:$0xff] %v1788_v58 }
 0x35e PF: > { %s16_s23 = sadd.s32 1, %s2090_s23   ;;  %s2993_s21 = smov %s2086_s22 }
 0x35f   : > { %p13_p5 = scmp.ge.s32.totalorder %s16_s23, 4   ;;  %s2994_s22 = smov %s2996_s24 }
 0x361   :  { %15 = sbr.rel (!%p13_p5) target bundleno = 2 (0x2), region = 77 }

</bundles_post_ra>
